<compile_context>
chip_gen: v7x
topology: tpu7x:2x2x1
jax: 0.10.0
libtpu: 0.0.40
codegen_flags: <defaults>
</compile_context>

<pallas_src>
import jax
import jax.numpy as jnp
from jax import lax
from jax.experimental import pallas as pl
from jax.experimental.pallas import tpu as pltpu

NEG_SLOPE = 0.2          # GATConv default negative_slope
NEG_INF = -1e30          # finite "masked" logit (avoids inf-inf NaNs)


def _round_up(v, m):
    return (v + m - 1) // m * m


def _pick_tiles():
    """Size tiles for this chip generation (conservative fallback)."""
    vmem = 64 * 1024 * 1024
    try:
        vmem = int(pltpu.get_tpu_info().vmem_capacity_bytes)
    except Exception:
        pass
    if vmem >= 128 * 1024 * 1024:          # v5e / v6e
        return 96 * 1024 * 1024, 512, 2048
    return 48 * 1024 * 1024, 256, 1024     # v7x (64 MiB / TC) and fallback


VMEM_LIMIT, MAX_TILE_I, MAX_TILE_J = _pick_tiles()


# ----------------------------------------------------------------------------
# Stage 1: xw = x @ W (bf16 out), plus per-node attention scalars a_src, a_dst.
# ----------------------------------------------------------------------------
def xw_kernel(x_ref, w_ref, att_src_ref, att_dst_ref,
              xw_ref, asrc_ref, adst_ref):
    xw = jnp.dot(x_ref[...].astype(jnp.bfloat16),
                 w_ref[...].astype(jnp.bfloat16),
                 preferred_element_type=jnp.float32)            # [TI, Dp] f32
    asrc_ref[...] = jnp.sum(xw * att_src_ref[...], axis=-1, keepdims=True)
    adst_ref[...] = jnp.sum(xw * att_dst_ref[...], axis=-1, keepdims=True)
    xw_ref[...] = xw.astype(jnp.bfloat16)


# ----------------------------------------------------------------------------
# Stage 2: online-softmax attention + aggregation, tiled over (dst, src).
# ----------------------------------------------------------------------------
def attn_agg_kernel(adst_ref, asrc_ref, adj_ref, xw_ref, bias_ref, o_ref,
                    m_sc, l_sc, acc_sc):
    ti, tj = adj_ref.shape
    j = pl.program_id(1)

    @pl.when(j == 0)
    def _():
        m_sc[...] = jnp.full(m_sc.shape, NEG_INF, m_sc.dtype)
        l_sc[...] = jnp.zeros(l_sc.shape, l_sc.dtype)
        acc_sc[...] = jnp.zeros(acc_sc.shape, acc_sc.dtype)

    # Edge multiplicities for this tile; diagonal forced to exactly 1
    # (GATConv add_self_loops: drop existing self loops, add one).
    row_ids = pl.program_id(0) * ti + lax.broadcasted_iota(jnp.int32, (ti, tj), 0)
    col_ids = j * tj + lax.broadcasted_iota(jnp.int32, (ti, tj), 1)
    counts = jnp.where(row_ids == col_ids, 1.0,
                       adj_ref[...].astype(jnp.float32))        # [TI, TJ] f32

    # Attention logits (a_src / a_dst precomputed in stage 1).
    e = adst_ref[...] + asrc_ref[...]                           # [TI, TJ]
    e = jnp.where(e > 0, e, NEG_SLOPE * e)                      # LeakyReLU
    e = jnp.where(counts > 0.0, e, NEG_INF)                     # mask non-edges

    # Online softmax update.
    m_prev = m_sc[...]
    m_new = jnp.maximum(m_prev, jnp.max(e, axis=-1, keepdims=True))
    corr = jnp.exp(m_prev - m_new)                              # [TI, 1]
    p = counts * jnp.exp(e - m_new)                             # [TI, TJ]
    l_sc[...] = corr * l_sc[...] + jnp.sum(p, axis=-1, keepdims=True)
    acc_sc[...] = corr * acc_sc[...] + jnp.dot(
        p.astype(jnp.bfloat16), xw_ref[...],
        preferred_element_type=jnp.float32)
    m_sc[...] = m_new

    @pl.when(j == pl.num_programs(1) - 1)
    def _():
        out = acc_sc[...] * pl.reciprocal(l_sc[...], approx=True) + bias_ref[...]
        o_ref[...] = jnp.tanh(out).astype(o_ref.dtype)


# ----------------------------------------------------------------------------
# Wrapper.
# ----------------------------------------------------------------------------
@jax.jit
def breadth_forward(x, edge_index, w, att_src, att_dst, bias):
    """GATConv(heads=1) + tanh.  edge_index rows = (src, dst)."""
    n, f_in = x.shape
    d = w.shape[1]
    d_pad = _round_up(d, 128)

    # Node padding: lane-friendly and evenly divisible by the chosen tiles.
    n_pad = _round_up(max(n, 128), 128)
    if n_pad > MAX_TILE_I:
        n_pad = _round_up(n_pad, MAX_TILE_I)
        tile_i = MAX_TILE_I
    else:
        tile_i = n_pad
    if n_pad > MAX_TILE_J:
        n_pad = _round_up(n_pad, MAX_TILE_J)   # MAX_TILE_J is a multiple of MAX_TILE_I
        tile_j = MAX_TILE_J
    else:
        tile_j = n_pad
    grid_i = n_pad // tile_i
    grid_j = n_pad // tile_j

    # Padded parameters / inputs (zero padding keeps the math exact).
    x_p = jnp.zeros((n_pad, f_in), jnp.float32).at[:n, :].set(x)
    w_p = jnp.zeros((f_in, d_pad), jnp.float32).at[:, :d].set(w)
    att_src_p = jnp.zeros((1, d_pad), jnp.float32).at[:, :d].set(att_src)
    att_dst_p = jnp.zeros((1, d_pad), jnp.float32).at[:, :d].set(att_dst)
    bias_p = jnp.zeros((1, d_pad), jnp.float32).at[:, :d].set(bias)

    # Dense edge-count matrix adj[i, j] = #edges (j -> i), one int8 scatter-add.
    # Self loops are enforced inside the kernel, so no eye/clip/cast passes.
    # TODO(synk): int8 counts wrap past 127 parallel edges between one pair.
    src, dst = edge_index[0], edge_index[1]
    adj = jnp.zeros((n_pad, n_pad), jnp.int8).at[dst, src].add(
        jnp.ones_like(src, dtype=jnp.int8))

    cparams1 = pltpu.CompilerParams(dimension_semantics=("parallel",),
                                    vmem_limit_bytes=VMEM_LIMIT)
    cparams2 = pltpu.CompilerParams(dimension_semantics=("parallel", "arbitrary"),
                                    vmem_limit_bytes=VMEM_LIMIT)

    # Stage 1: xw (bf16) + a_src / a_dst (f32), tiled over node rows.
    xw, a_src, a_dst = pl.pallas_call(
        xw_kernel,
        out_shape=(jax.ShapeDtypeStruct((n_pad, d_pad), jnp.bfloat16),
                   jax.ShapeDtypeStruct((n_pad, 1), jnp.float32),
                   jax.ShapeDtypeStruct((n_pad, 1), jnp.float32)),
        grid=(grid_i,),
        in_specs=[pl.BlockSpec((tile_i, f_in), lambda i: (i, 0)),
                  pl.BlockSpec((f_in, d_pad), lambda i: (0, 0)),
                  pl.BlockSpec((1, d_pad), lambda i: (0, 0)),
                  pl.BlockSpec((1, d_pad), lambda i: (0, 0))],
        out_specs=(pl.BlockSpec((tile_i, d_pad), lambda i: (i, 0)),
                   pl.BlockSpec((tile_i, 1), lambda i: (i, 0)),
                   pl.BlockSpec((tile_i, 1), lambda i: (i, 0))),
        compiler_params=cparams1,
    )(x_p, w_p, att_src_p, att_dst_p)

    # a_src as a lane-major row vector (free reshape of contiguous memory).
    a_src_row = a_src.reshape(1, n_pad)

    # Stage 2: flash-style masked softmax + aggregation over src blocks.
    out = pl.pallas_call(
        attn_agg_kernel,
        out_shape=jax.ShapeDtypeStruct((n_pad, d_pad), jnp.float32),
        grid=(grid_i, grid_j),
        in_specs=[pl.BlockSpec((tile_i, 1), lambda i, j: (i, 0)),        # a_dst
                  pl.BlockSpec((1, tile_j), lambda i, j: (0, j)),        # a_src
                  pl.BlockSpec((tile_i, tile_j), lambda i, j: (i, j)),   # adj
                  pl.BlockSpec((tile_j, d_pad), lambda i, j: (j, 0)),    # xw src
                  pl.BlockSpec((1, d_pad), lambda i, j: (0, 0))],        # bias
        out_specs=pl.BlockSpec((tile_i, d_pad), lambda i, j: (i, 0)),
        scratch_shapes=[pltpu.VMEM((tile_i, 1), jnp.float32),            # m
                        pltpu.VMEM((tile_i, 1), jnp.float32),            # l
                        pltpu.VMEM((tile_i, d_pad), jnp.float32)],       # acc
        compiler_params=cparams2,
    )(a_dst, a_src_row, adj, xw, bias_p)

    return out[:n, :d]


if __name__ == "__main__":
    key = jax.random.PRNGKey(0)
    N, F_IN, D, E = 8, 32, 64, 24

    k_x, k_src, k_dst, k_w, k_as, k_ad = jax.random.split(key, 6)

    # Inputs.
    x = jax.random.normal(k_x, (N, F_IN), jnp.float32)
    src = jax.random.randint(k_src, (E,), 0, N)
    dst = jax.random.randint(k_dst, (E,), 0, N)
    edge_index = jnp.stack([src, dst], axis=0)    # [2, E], row0=src, row1=dst

    # Deterministic GATConv(heads=1) parameters (glorot-like, zero bias).
    g_w = (6.0 / (F_IN + D)) ** 0.5
    w = jax.random.uniform(k_w, (F_IN, D), jnp.float32, -g_w, g_w)
    g_a = (6.0 / (1 + D)) ** 0.5
    att_src = jax.random.uniform(k_as, (1, D), jnp.float32, -g_a, g_a)
    att_dst = jax.random.uniform(k_ad, (1, D), jnp.float32, -g_a, g_a)
    bias = jnp.zeros((1, D), jnp.float32)

    out = breadth_forward(x, edge_index, w, att_src, att_dst, bias)
    jax.block_until_ready(out)
    assert out.shape == (N, D) and out.dtype == jnp.float32
    assert bool(jnp.all(jnp.isfinite(out)))

    # Pure-JAX f32 reference; bf16 MXU operands + approx reciprocal give small
    # numeric deltas, so use a loose tolerance (outputs live in [-1, 1]).
    def reference(x, edge_index, w, att_src, att_dst, bias):
        n = x.shape[0]
        xw = x @ w
        adj = jnp.zeros((n, n), jnp.float32).at[edge_index[1],
                                                edge_index[0]].add(1.0)
        eye = jnp.eye(n, dtype=jnp.float32)
        adj = adj * (1.0 - eye) + eye
        a_dst = (xw * att_dst).sum(-1)[:, None]
        a_src = (xw * att_src).sum(-1)[None, :]
        e = a_dst + a_src
        e = jnp.where(e > 0, e, NEG_SLOPE * e)
        e = jnp.where(adj > 0, e, -jnp.inf)
        p = adj * jnp.exp(e - e.max(-1, keepdims=True))
        attn = p / p.sum(-1, keepdims=True)
        return jnp.tanh(attn @ xw + bias)

    ref = reference(x, edge_index, w, att_src, att_dst, bias)
    assert float(jnp.max(jnp.abs(out - ref))) < 0.08
    print("KERNEL_OK")
</pallas_src>

<mosaic_0001>
module attributes {stable_mosaic.version = 11 : i64} {
  func.func @xw_kernel(%arg0: i32, %arg1: memref<128x32xf32, #tpu.memory_space<vmem>>, %arg2: memref<32x128xf32, #tpu.memory_space<vmem>>, %arg3: memref<1x128xf32, #tpu.memory_space<vmem>>, %arg4: memref<1x128xf32, #tpu.memory_space<vmem>>, %arg5: memref<128x128xbf16, #tpu.memory_space<vmem>>, %arg6: memref<128x1xf32, #tpu.memory_space<vmem>>, %arg7: memref<128x1xf32, #tpu.memory_space<vmem>>) attributes {dimension_semantics = [#tpu.dimension_semantics<parallel>], iteration_bounds = array<i64: 1>, scalar_prefetch = 0 : i64, scratch_operands = 0 : i64, tpu.core_type = #tpu.core_type<tc>, window_params = [{transform_indices = @transform_0, window_bounds = array<i64: 128, 32>}, {pipeline_mode = #tpu.pipeline_mode<synchronous>, transform_indices = @transform_1, window_bounds = array<i64: 32, 128>}, {pipeline_mode = #tpu.pipeline_mode<synchronous>, transform_indices = @transform_2, window_bounds = array<i64: 1, 128>}, {pipeline_mode = #tpu.pipeline_mode<synchronous>, transform_indices = @transform_3, window_bounds = array<i64: 1, 128>}, {transform_indices = @transform_4, window_bounds = array<i64: 128, 128>}, {transform_indices = @transform_5, window_bounds = array<i64: 128, 1>}, {transform_indices = @transform_6, window_bounds = array<i64: 128, 1>}]} {
    %c0 = arith.constant 0 : index
    %c0_0 = arith.constant 0 : index
    %0 = vector.load %arg1[%c0, %c0_0] : memref<128x32xf32, #tpu.memory_space<vmem>>, vector<128x32xf32>
    %1 = arith.truncf %0 : vector<128x32xf32> to vector<128x32xbf16>
    %c0_1 = arith.constant 0 : index
    %c0_2 = arith.constant 0 : index
    %2 = vector.load %arg2[%c0_1, %c0_2] : memref<32x128xf32, #tpu.memory_space<vmem>>, vector<32x128xf32>
    %3 = arith.truncf %2 : vector<32x128xf32> to vector<32x128xbf16>
    %cst = arith.constant dense<0.000000e+00> : vector<128x128xf32>
    %4 = tpu.matmul %1, %3, %cst {dimension_numbers = #tpu.dot_dimension_numbers<[1], [0], [0], [1], [0, 0, 1, 1], [], []>} : vector<128x32xbf16>, vector<32x128xbf16>, vector<128x128xf32> -> vector<128x128xf32>
    %c0_3 = arith.constant 0 : index
    %c0_4 = arith.constant 0 : index
    %5 = vector.load %arg3[%c0_3, %c0_4] : memref<1x128xf32, #tpu.memory_space<vmem>>, vector<1x128xf32>
    %6 = vector.broadcast %5 : vector<1x128xf32> to vector<128x128xf32>
    %7 = arith.mulf %4, %6 : vector<128x128xf32>
    %cst_5 = arith.constant dense<0.000000e+00> : vector<128xf32>
    %8 = vector.multi_reduction <add>, %7, %cst_5 [1] : vector<128x128xf32> to vector<128xf32>
    %9 = vector.shape_cast %8 : vector<128xf32> to vector<128x1xf32>
    %c0_6 = arith.constant 0 : index
    %c0_7 = arith.constant 0 : index
    %10 = vector.load %arg6[%c0_6, %c0_7] : memref<128x1xf32, #tpu.memory_space<vmem>>, vector<128x1xf32>
    tpu.vector_store %arg6[%c0_6, %c0_7], %9 {strides = array<i32>} : memref<128x1xf32, #tpu.memory_space<vmem>>, vector<128x1xf32>,
    %c0_8 = arith.constant 0 : index
    %c0_9 = arith.constant 0 : index
    %11 = vector.load %arg4[%c0_8, %c0_9] : memref<1x128xf32, #tpu.memory_space<vmem>>, vector<1x128xf32>
    %12 = vector.broadcast %11 : vector<1x128xf32> to vector<128x128xf32>
    %13 = arith.mulf %4, %12 : vector<128x128xf32>
    %cst_10 = arith.constant dense<0.000000e+00> : vector<128xf32>
    %14 = vector.multi_reduction <add>, %13, %cst_10 [1] : vector<128x128xf32> to vector<128xf32>
    %15 = vector.shape_cast %14 : vector<128xf32> to vector<128x1xf32>
    %c0_11 = arith.constant 0 : index
    %c0_12 = arith.constant 0 : index
    %16 = vector.load %arg7[%c0_11, %c0_12] : memref<128x1xf32, #tpu.memory_space<vmem>>, vector<128x1xf32>
    tpu.vector_store %arg7[%c0_11, %c0_12], %15 {strides = array<i32>} : memref<128x1xf32, #tpu.memory_space<vmem>>, vector<128x1xf32>,
    %17 = arith.truncf %4 : vector<128x128xf32> to vector<128x128xbf16>
    %c0_13 = arith.constant 0 : index
    %c0_14 = arith.constant 0 : index
    %18 = vector.load %arg5[%c0_13, %c0_14] : memref<128x128xbf16, #tpu.memory_space<vmem>>, vector<128x128xbf16>
    tpu.vector_store %arg5[%c0_13, %c0_14], %17 {strides = array<i32>} : memref<128x128xbf16, #tpu.memory_space<vmem>>, vector<128x128xbf16>,
    return
  }
  func.func @transform_0(%arg0: i32) -> (i32, i32) {
    %c0_i32 = arith.constant 0 : i32
    %c0_i32_0 = arith.constant 0 : i32
    return %arg0, %c0_i32 : i32, i32
  }
  func.func @transform_1(%arg0: i32) -> (i32, i32) {
    %c0_i32 = arith.constant 0 : i32
    %c0_i32_0 = arith.constant 0 : i32
    %c0_i32_1 = arith.constant 0 : i32
    return %c0_i32, %c0_i32_0 : i32, i32
  }
  func.func @transform_2(%arg0: i32) -> (i32, i32) {
    %c0_i32 = arith.constant 0 : i32
    %c0_i32_0 = arith.constant 0 : i32
    %c0_i32_1 = arith.constant 0 : i32
    return %c0_i32, %c0_i32_0 : i32, i32
  }
  func.func @transform_3(%arg0: i32) -> (i32, i32) {
    %c0_i32 = arith.constant 0 : i32
    %c0_i32_0 = arith.constant 0 : i32
    %c0_i32_1 = arith.constant 0 : i32
    return %c0_i32, %c0_i32_0 : i32, i32
  }
  func.func @transform_4(%arg0: i32) -> (i32, i32) {
    %c0_i32 = arith.constant 0 : i32
    %c0_i32_0 = arith.constant 0 : i32
    return %arg0, %c0_i32 : i32, i32
  }
  func.func @transform_5(%arg0: i32) -> (i32, i32) {
    %c0_i32 = arith.constant 0 : i32
    %c0_i32_0 = arith.constant 0 : i32
    return %arg0, %c0_i32 : i32, i32
  }
  func.func @transform_6(%arg0: i32) -> (i32, i32) {
    %c0_i32 = arith.constant 0 : i32
    %c0_i32_0 = arith.constant 0 : i32
    return %arg0, %c0_i32 : i32, i32
  }
}

module attributes {stable_mosaic.version = 11 : i64} {
  func.func @attn_agg_kernel(%arg0: i32, %arg1: i32, %arg2: memref<128x1xf32, #tpu.memory_space<vmem>>, %arg3: memref<1x128xf32, #tpu.memory_space<vmem>>, %arg4: memref<128x128xi8, #tpu.memory_space<vmem>>, %arg5: memref<128x128xbf16, #tpu.memory_space<vmem>>, %arg6: memref<1x128xf32, #tpu.memory_space<vmem>>, %arg7: memref<128x128xf32, #tpu.memory_space<vmem>>, %arg8: memref<128x1xf32, #tpu.memory_space<vmem>>, %arg9: memref<128x1xf32, #tpu.memory_space<vmem>>, %arg10: memref<128x128xf32, #tpu.memory_space<vmem>>) attributes {dimension_semantics = [#tpu.dimension_semantics<parallel>, #tpu.dimension_semantics<arbitrary>], iteration_bounds = array<i64: 1, 1>, scalar_prefetch = 0 : i64, scratch_operands = 3 : i64, tpu.core_type = #tpu.core_type<tc>, window_params = [{transform_indices = @transform_0, window_bounds = array<i64: 128, 1>}, {transform_indices = @transform_1, window_bounds = array<i64: 1, 128>}, {transform_indices = @transform_2, window_bounds = array<i64: 128, 128>}, {transform_indices = @transform_3, window_bounds = array<i64: 128, 128>}, {pipeline_mode = #tpu.pipeline_mode<synchronous>, transform_indices = @transform_4, window_bounds = array<i64: 1, 128>}, {transform_indices = @transform_5, window_bounds = array<i64: 128, 128>}]} {
    %c0_i32 = arith.constant 0 : i32
    %0 = arith.cmpi eq, %arg1, %c0_i32 : i32
    %1 = arith.extui %0 : i1 to i32
    %c0_i32_0 = arith.constant 0 : i32
    %2 = arith.cmpi ne, %1, %c0_i32_0 : i32
    scf.if %2 {
      %cst_30 = arith.constant -1.000000e+30 : f32
      %58 = vector.broadcast %cst_30 : f32 to vector<128x1xf32>
      %c0_31 = arith.constant 0 : index
      %c0_32 = arith.constant 0 : index
      %59 = vector.load %arg8[%c0_31, %c0_32] : memref<128x1xf32, #tpu.memory_space<vmem>>, vector<128x1xf32>
      tpu.vector_store %arg8[%c0_31, %c0_32], %58 {strides = array<i32>} : memref<128x1xf32, #tpu.memory_space<vmem>>, vector<128x1xf32>,
      %cst_33 = arith.constant 0.000000e+00 : f32
      %60 = vector.broadcast %cst_33 : f32 to vector<128x1xf32>
      %c0_34 = arith.constant 0 : index
      %c0_35 = arith.constant 0 : index
      %61 = vector.load %arg9[%c0_34, %c0_35] : memref<128x1xf32, #tpu.memory_space<vmem>>, vector<128x1xf32>
      tpu.vector_store %arg9[%c0_34, %c0_35], %60 {strides = array<i32>} : memref<128x1xf32, #tpu.memory_space<vmem>>, vector<128x1xf32>,
      %cst_36 = arith.constant 0.000000e+00 : f32
      %62 = vector.broadcast %cst_36 : f32 to vector<128x128xf32>
      %c0_37 = arith.constant 0 : index
      %c0_38 = arith.constant 0 : index
      %63 = vector.load %arg10[%c0_37, %c0_38] : memref<128x128xf32, #tpu.memory_space<vmem>>, vector<128x128xf32>
      tpu.vector_store %arg10[%c0_37, %c0_38], %62 {strides = array<i32>} : memref<128x128xf32, #tpu.memory_space<vmem>>, vector<128x128xf32>,
    } else {
    }
    %c128_i32 = arith.constant 128 : i32
    %3 = arith.muli %arg0, %c128_i32 : i32
    %4 = tpu.iota {dimensions = array<i32: 0>} : vector<128x128xi32>
    %5 = vector.broadcast %3 : i32 to vector<128x128xi32>
    %6 = arith.addi %5, %4 : vector<128x128xi32>
    %c128_i32_1 = arith.constant 128 : i32
    %7 = arith.muli %arg1, %c128_i32_1 : i32
    %8 = tpu.iota {dimensions = array<i32: 1>} : vector<128x128xi32>
    %9 = vector.broadcast %7 : i32 to vector<128x128xi32>
    %10 = arith.addi %9, %8 : vector<128x128xi32>
    %11 = arith.cmpi eq, %6, %10 : vector<128x128xi32>
    %c0 = arith.constant 0 : index
    %c0_2 = arith.constant 0 : index
    %12 = vector.load %arg4[%c0, %c0_2] : memref<128x128xi8, #tpu.memory_space<vmem>>, vector<128x128xi8>
    %13 = arith.sitofp %12 : vector<128x128xi8> to vector<128x128xf32>
    %cst = arith.constant 1.000000e+00 : f32
    %14 = vector.broadcast %cst : f32 to vector<128x128xf32>
    %15 = arith.select %11, %14, %13 : vector<128x128xi1>, vector<128x128xf32>
    %c0_3 = arith.constant 0 : index
    %c0_4 = arith.constant 0 : index
    %16 = vector.load %arg2[%c0_3, %c0_4] : memref<128x1xf32, #tpu.memory_space<vmem>>, vector<128x1xf32>
    %c0_5 = arith.constant 0 : index
    %c0_6 = arith.constant 0 : index
    %17 = vector.load %arg3[%c0_5, %c0_6] : memref<1x128xf32, #tpu.memory_space<vmem>>, vector<1x128xf32>
    %18 = vector.broadcast %16 : vector<128x1xf32> to vector<128x128xf32>
    %19 = vector.broadcast %17 : vector<1x128xf32> to vector<128x128xf32>
    %20 = arith.addf %18, %19 : vector<128x128xf32>
    %cst_7 = arith.constant 0.000000e+00 : f32
    %21 = vector.broadcast %cst_7 : f32 to vector<128x128xf32>
    %22 = arith.cmpf ogt, %20, %21 : vector<128x128xf32>
    %cst_8 = arith.constant 2.000000e-01 : f32
    %23 = vector.broadcast %cst_8 : f32 to vector<128x128xf32>
    %24 = arith.mulf %23, %20 : vector<128x128xf32>
    %25 = arith.select %22, %20, %24 : vector<128x128xi1>, vector<128x128xf32>
    %cst_9 = arith.constant 0.000000e+00 : f32
    %26 = vector.broadcast %cst_9 : f32 to vector<128x128xf32>
    %27 = arith.cmpf ogt, %15, %26 : vector<128x128xf32>
    %cst_10 = arith.constant -1.000000e+30 : f32
    %28 = vector.broadcast %cst_10 : f32 to vector<128x128xf32>
    %29 = arith.select %27, %25, %28 : vector<128x128xi1>, vector<128x128xf32>
    %c0_11 = arith.constant 0 : index
    %c0_12 = arith.constant 0 : index
    %30 = vector.load %arg8[%c0_11, %c0_12] : memref<128x1xf32, #tpu.memory_space<vmem>>, vector<128x1xf32>
    %cst_13 = arith.constant dense<0xFF800000> : vector<128xf32>
    %31 = vector.multi_reduction <maximumf>, %29, %cst_13 [1] : vector<128x128xf32> to vector<128xf32>
    %32 = vector.shape_cast %31 : vector<128xf32> to vector<128x1xf32>
    %33 = arith.maximumf %30, %32 : vector<128x1xf32>
    %34 = arith.subf %30, %33 : vector<128x1xf32>
    %35 = math.exp %34 : vector<128x1xf32>
    %36 = vector.broadcast %33 : vector<128x1xf32> to vector<128x128xf32>
    %37 = arith.subf %29, %36 : vector<128x128xf32>
    %38 = math.exp %37 : vector<128x128xf32>
    %39 = arith.mulf %15, %38 : vector<128x128xf32>
    %c0_14 = arith.constant 0 : index
    %c0_15 = arith.constant 0 : index
    %40 = vector.load %arg9[%c0_14, %c0_15] : memref<128x1xf32, #tpu.memory_space<vmem>>, vector<128x1xf32>
    %41 = arith.mulf %35, %40 : vector<128x1xf32>
    %cst_16 = arith.constant dense<0.000000e+00> : vector<128xf32>
    %42 = vector.multi_reduction <add>, %39, %cst_16 [1] : vector<128x128xf32> to vector<128xf32>
    %43 = vector.shape_cast %42 : vector<128xf32> to vector<128x1xf32>
    %44 = arith.addf %41, %43 : vector<128x1xf32>
    %c0_17 = arith.constant 0 : index
    %c0_18 = arith.constant 0 : index
    %45 = vector.load %arg9[%c0_17, %c0_18] : memref<128x1xf32, #tpu.memory_space<vmem>>, vector<128x1xf32>
    tpu.vector_store %arg9[%c0_17, %c0_18], %44 {strides = array<i32>} : memref<128x1xf32, #tpu.memory_space<vmem>>, vector<128x1xf32>,
    %c0_19 = arith.constant 0 : index
    %c0_20 = arith.constant 0 : index
    %46 = vector.load %arg10[%c0_19, %c0_20] : memref<128x128xf32, #tpu.memory_space<vmem>>, vector<128x128xf32>
    %47 = vector.broadcast %35 : vector<128x1xf32> to vector<128x128xf32>
    %48 = arith.mulf %47, %46 : vector<128x128xf32>
    %49 = arith.truncf %39 : vector<128x128xf32> to vector<128x128xbf16>
    %c0_21 = arith.constant 0 : index
    %c0_22 = arith.constant 0 : index
    %50 = vector.load %arg5[%c0_21, %c0_22] : memref<128x128xbf16, #tpu.memory_space<vmem>>, vector<128x128xbf16>
    %cst_23 = arith.constant dense<0.000000e+00> : vector<128x128xf32>
    %51 = tpu.matmul %49, %50, %cst_23 {dimension_numbers = #tpu.dot_dimension_numbers<[1], [0], [0], [1], [0, 0, 1, 1], [], []>} : vector<128x128xbf16>, vector<128x128xbf16>, vector<128x128xf32> -> vector<128x128xf32>
    %52 = arith.addf %48, %51 : vector<128x128xf32>
    %c0_24 = arith.constant 0 : index
    %c0_25 = arith.constant 0 : index
    %53 = vector.load %arg10[%c0_24, %c0_25] : memref<128x128xf32, #tpu.memory_space<vmem>>, vector<128x128xf32>
    tpu.vector_store %arg10[%c0_24, %c0_25], %52 {strides = array<i32>} : memref<128x128xf32, #tpu.memory_space<vmem>>, vector<128x128xf32>,
    %c0_26 = arith.constant 0 : index
    %c0_27 = arith.constant 0 : index
    %54 = vector.load %arg8[%c0_26, %c0_27] : memref<128x1xf32, #tpu.memory_space<vmem>>, vector<128x1xf32>
    tpu.vector_store %arg8[%c0_26, %c0_27], %33 {strides = array<i32>} : memref<128x1xf32, #tpu.memory_space<vmem>>, vector<128x1xf32>,
    %c0_i32_28 = arith.constant 0 : i32
    %55 = arith.cmpi eq, %arg1, %c0_i32_28 : i32
    %56 = arith.extui %55 : i1 to i32
    %c0_i32_29 = arith.constant 0 : i32
    %57 = arith.cmpi ne, %56, %c0_i32_29 : i32
    scf.if %57 {
      %c0_30 = arith.constant 0 : index
      %c0_31 = arith.constant 0 : index
      %58 = vector.load %arg10[%c0_30, %c0_31] : memref<128x128xf32, #tpu.memory_space<vmem>>, vector<128x128xf32>
      %c0_32 = arith.constant 0 : index
      %c0_33 = arith.constant 0 : index
      %59 = vector.load %arg9[%c0_32, %c0_33] : memref<128x1xf32, #tpu.memory_space<vmem>>, vector<128x1xf32>
      %60 = tpu.reciprocal %59 {approx = true} : vector<128x1xf32> -> vector<128x1xf32>
      %61 = vector.broadcast %60 : vector<128x1xf32> to vector<128x128xf32>
      %62 = arith.mulf %58, %61 : vector<128x128xf32>
      %c0_34 = arith.constant 0 : index
      %c0_35 = arith.constant 0 : index
      %63 = vector.load %arg6[%c0_34, %c0_35] : memref<1x128xf32, #tpu.memory_space<vmem>>, vector<1x128xf32>
      %64 = vector.broadcast %63 : vector<1x128xf32> to vector<128x128xf32>
      %65 = arith.addf %62, %64 : vector<128x128xf32>
      %66 = math.tanh %65 : vector<128x128xf32>
      %c0_36 = arith.constant 0 : index
      %c0_37 = arith.constant 0 : index
      %67 = vector.load %arg7[%c0_36, %c0_37] : memref<128x128xf32, #tpu.memory_space<vmem>>, vector<128x128xf32>
      tpu.vector_store %arg7[%c0_36, %c0_37], %66 {strides = array<i32>} : memref<128x128xf32, #tpu.memory_space<vmem>>, vector<128x128xf32>,
    } else {
    }
    return
  }
  func.func @transform_0(%arg0: i32, %arg1: i32) -> (i32, i32) {
    %c0_i32 = arith.constant 0 : i32
    %c0_i32_0 = arith.constant 0 : i32
    return %arg0, %c0_i32 : i32, i32
  }
  func.func @transform_1(%arg0: i32, %arg1: i32) -> (i32, i32) {
    %c0_i32 = arith.constant 0 : i32
    %c0_i32_0 = arith.constant 0 : i32
    return %c0_i32, %arg1 : i32, i32
  }
  func.func @transform_2(%arg0: i32, %arg1: i32) -> (i32, i32) {
    %c0_i32 = arith.constant 0 : i32
    return %arg0, %arg1 : i32, i32
  }
  func.func @transform_3(%arg0: i32, %arg1: i32) -> (i32, i32) {
    %c0_i32 = arith.constant 0 : i32
    %c0_i32_0 = arith.constant 0 : i32
    return %arg1, %c0_i32 : i32, i32
  }
  func.func @transform_4(%arg0: i32, %arg1: i32) -> (i32, i32) {
    %c0_i32 = arith.constant 0 : i32
    %c0_i32_0 = arith.constant 0 : i32
    %c0_i32_1 = arith.constant 0 : i32
    return %c0_i32, %c0_i32_0 : i32, i32
  }
  func.func @transform_5(%arg0: i32, %arg1: i32) -> (i32, i32) {
    %c0_i32 = arith.constant 0 : i32
    %c0_i32_0 = arith.constant 0 : i32
    return %arg0, %c0_i32 : i32, i32
  }
}

</mosaic_0001>

<bundles_post_ra>
// kernel: breadth_forward.2
= control target key start
LH: loop header
LB: loop body
LE: loop exit
PB: predicated region body
PF: predicated region fallthrough
CT: control target
= control target key end

     0   :  { %vm51_vm0 = vcmask 261120   ;;  %vm228_vm1 = vcmask 7168   ;;  %s833_s1 = inlined_call_operand.vmem [shape: f32[32,128], index: 1, kind: input, shape index: {}]   ;;  %s834_s0 = inlined_call_operand.vmem [shape: f32[128,32], index: 0, kind: input, shape index: {}]   ;;  %s835_s2 = inlined_call_operand.vmem [shape: f32[1,128], index: 2, kind: input, shape index: {}]   ;;  %s836_s3 = inlined_call_operand.vmem [shape: f32[1,128], index: 3, kind: input, shape index: {}]   ;;  %s837_s4 = inlined_call_operand.vmem [shape: bf16[128,128], index: 4, kind: output, shape index: {0}]   ;;  %s838_s5 = inlined_call_operand.vmem [shape: f32[128,1], index: 5, kind: output, shape index: {1}]   ;;  %s839_s6 = inlined_call_operand.vmem [shape: f32[128,1], index: 6, kind: output, shape index: {2}]  }
   0x1   :  { %v45_v0 = vld [vmem:[%s833_s1] sm:$0xff]  ;;  %v46_v1 = vld [vmem:[%s833_s1 + $0x8] sm:$0xff]  ;;  %v47_v2 = vld [vmem:[%s833_s1 + $0x10] sm:$0xff] }
   0x2   :  { %v49_v3 = vpack.c.bf16 %v46_v1, %v45_v0  ;;  %v48_v4 = vld [vmem:[%s833_s1 + $0x18] sm:$0xff]  ;;  %v21_v5 = vld [vmem:[%s834_s0] sm:$0xff]  ;;  %v22_v6 = vld [vmem:[%s834_s0 + $0x8] sm:$0xff] }
   0x3   :  { %v50_v7 = vpack.c.bf16 %v48_v4, %v47_v2  ;;  %v37_v8 = vpack.c.bf16 %v22_v6, %v21_v5  ;;  %v29_v9 = vld [vmem:[%s834_s0 + $0x40] sm:$0xff]  ;;  %v30_v10 = vld [vmem:[%s834_s0 + $0x48] sm:$0xff]  ;;  %v23_v12 = vld [vmem:[%s834_s0 + $0x10] sm:$0xff] }
   0x4   :  { %507 = vmatprep.subr.bf16.mxu0 %v49_v3  ;;  %527 = vmatprep.subr.bf16.mxu1 %v49_v3  ;;  %v41_v11 = vpack.c.bf16 %v30_v10, %v29_v9  ;;  %v24_v13 = vld [vmem:[%s834_s0 + $0x18] sm:$0xff]  ;;  %v31_v14 = vld [vmem:[%s834_s0 + $0x50] sm:$0xff]  ;;  %v25_v16 = vld [vmem:[%s834_s0 + $0x20] sm:$0xff] }
   0x5   :  { %508 = vmatpush3.bf16.msra.mxu0 %v49_v3  ;;  %529 = vmatpush3.bf16.msra.mxu1 %v49_v3  ;;  %v32_v15 = vld [vmem:[%s834_s0 + $0x58] sm:$0xff]  ;;  %v26_v17 = vld [vmem:[%s834_s0 + $0x28] sm:$0xff]  ;;  %v33_v18 = vld [vmem:[%s834_s0 + $0x60] sm:$0xff]  ;;  %v38_v20 = vpack.c.bf16 %v24_v13, %v23_v12 }
   0x6   :  { %509 = vmatprep.subr.bf16.mxu0 %v50_v7  ;;  %528 = vmatprep.subr.bf16.mxu1 %v50_v7  ;;  %v34_v19 = vld [vmem:[%s834_s0 + $0x68] sm:$0xff]  ;;  %v42_v21 = vpack.c.bf16 %v32_v15, %v31_v14  ;;  %v39_v22 = vpack.c.bf16 %v26_v17, %v25_v16  ;;  %v27_v24 = vld [vmem:[%s834_s0 + $0x30] sm:$0xff]  ;;  %v28_v25 = vld [vmem:[%s834_s0 + $0x38] sm:$0xff] }
   0x7   :  { %511 = vmatprep.mubr.msk.bf16.mxu0 %vm51_vm0, %v37_v8  ;;  %519 = vmatprep.mubr.msk.bf16.mxu1 %vm51_vm0, %v41_v11  ;;  %v43_v23 = vpack.c.bf16 %v34_v19, %v33_v18  ;;  %v35_v26 = vld [vmem:[%s834_s0 + $0x70] sm:$0xff]  ;;  %v36_v27 = vld [vmem:[%s834_s0 + $0x78] sm:$0xff]  ;;  %v40_v28 = vpack.c.bf16 %v28_v25, %v27_v24  ;;  %v637_v30 = vld [vmem:[%s835_s2] ss:$0 sm:$0xff] }
   0x8   :  { %v44_v29 = vpack.c.bf16 %v36_v27, %v35_v26  ;;  %v644_v39 = vld [vmem:[%s836_s3] ss:$0 sm:$0xff] }
   0x9   :  { %510 = vmatpush3.bf16.msra.mxu0 %v50_v7  ;;  %530 = vmatpush3.bf16.msra.mxu1 %v50_v7 }
   0xc   :  { %512 = vmatmul.mubr.msk.bf16.vlgmr.msra.gmra.mrb[0].mxu0 %vm51_vm0, %v38_v20  ;;  %520 = vmatmul.mubr.msk.bf16.vlgmr.msra.gmra.mrb[0].mxu1 %vm51_vm0, %v42_v21 }
   0xd   :  { %515 = vmatprep.mubr.msk.bf16.mxu0 %vm51_vm0, %v39_v22  ;;  %523 = vmatprep.mubr.msk.bf16.mxu1 %vm51_vm0, %v43_v23 }
  0x14   :  { %516 = vmatmul.mubr.msk.bf16.gmra.mrb[4].mxu0 %vm51_vm0, %v40_v28  ;;  %524 = vmatmul.mubr.msk.bf16.gmra.mrb[4].mxu1 %vm51_vm0, %v44_v29 }
  0xdf   :  { %v513_v31 = vpop.f32.mrb[0].mxu0  ;;  %v521_v32 = vpop.f32.mrb[0].mxu1 }
  0xe0   :  { %v110_v33 = vpop.f32.mrb[1].mxu0  ;;  %v142_v34 = vpop.f32.mrb[1].mxu1  ;;  %v190_v35 = vmul.f32 %v521_v32, %v637_v30  ;;  %v182_v36 = vmul.f32 %v513_v31, %v637_v30  ;;  %v254_v46 = vmul.f32 %v513_v31, %v644_v39  ;;  %v262_v50 = vmul.f32 %v521_v32, %v644_v39 }
  0xe1   :  { %v514_v37 = vpop.f32.mrb[2].mxu0  ;;  %v522_v38 = vpop.f32.mrb[2].mxu1  ;;  %v180_v62 = vmul.f32 %v637_v30, %v110_v33  ;;  %v188_v0 = vmul.f32 %v637_v30, %v142_v34  ;;  %v252_v2 = vmul.f32 %v644_v39, %v110_v33  ;;  %v260_v4 = vmul.f32 %v644_v39, %v142_v34 }
  0xe2   :  { %v458_v40 = vpack.c.bf16 %v514_v37, %v513_v31  ;;  %v478_v41 = vpack.c.bf16 %v522_v38, %v521_v32  ;;  %216 = vadd.xlane.f32.xlu0 %v190_v35  ;;  %v145_v42 = vpop.f32.mrb[3].mxu1  ;;  %200 = vadd.xlane.f32.xlu1 %v182_v36  ;;  %v113_v43 = vpop.f32.mrb[3].mxu0  ;;  %v183_v47 = vmul.f32 %v514_v37, %v637_v30 }
  0xe3   :  { %v473_v44 = vpack.c.bf16 %v145_v42, %v142_v34  ;;  %v453_v45 = vpack.c.bf16 %v113_v43, %v110_v33  ;;  %v191_v51 = vmul.f32 %v522_v38, %v637_v30  ;;  %v255_v63 = vmul.f32 %v514_v37, %v644_v39 }
  0xe4   :  { %490 = vst [vmem:[%s837_s4 + $0x8] sm:$0xff] %v458_v40   ;;  %494 = vst [vmem:[%s837_s4 + $0x28] sm:$0xff] %v478_v41   ;;  %v263_v1 = vmul.f32 %v522_v38, %v644_v39  ;;  %v189_v3 = vmul.f32 %v637_v30, %v145_v42  ;;  %v253_v5 = vmul.f32 %v644_v39, %v113_v43 }
  0xe5   :  { %493 = vst [vmem:[%s837_s4 + $0x20] sm:$0xff] %v473_v44   ;;  %454 = vst [vmem:[%s837_s4] sm:$0xff] %v453_v45   ;;  %v261_v6 = vmul.f32 %v644_v39, %v145_v42  ;;  %v181_v7 = vmul.f32 %v637_v30, %v113_v43 }
  0xe6   :  { %272 = vadd.xlane.f32.xlu0 %v254_v46  ;;  %202 = vadd.xlane.f32.xlu1 %v183_v47 }
  0xe7   :  { %v517_v48 = vpop.f32.mrb[4].mxu0  ;;  %v660_v49 = vpop.f32.mrb[4].mxu1 }
  0xe8   :  { %v126_v52 = vpop.f32.mrb[5].mxu0  ;;  %v158_v53 = vpop.f32.mrb[5].mxu1  ;;  %v186_v8 = vmul.f32 %v517_v48, %v637_v30  ;;  %v194_v10 = vmul.f32 %v660_v49, %v637_v30  ;;  %v258_v12 = vmul.f32 %v517_v48, %v644_v39  ;;  %v266_v22 = vmul.f32 %v660_v49, %v644_v39 }
  0xe9   :  { %v518_v54 = vpop.f32.mrb[6].mxu0  ;;  %v526_v55 = vpop.f32.mrb[6].mxu1  ;;  %v184_v14 = vmul.f32 %v637_v30, %v126_v52  ;;  %v192_v16 = vmul.f32 %v637_v30, %v158_v53  ;;  %v256_v18 = vmul.f32 %v644_v39, %v126_v52  ;;  %v264_v20 = vmul.f32 %v644_v39, %v158_v53 }
  0xea   :  { %288 = vadd.xlane.f32.xlu0 %v262_v50  ;;  %218 = vadd.xlane.f32.xlu1 %v191_v51  ;;  %v468_v56 = vpack.c.bf16 %v518_v54, %v517_v48  ;;  %v129_v57 = vpop.f32.mrb[7].mxu0  ;;  %v488_v58 = vpack.c.bf16 %v526_v55, %v660_v49  ;;  %v161_v59 = vpop.f32.mrb[7].mxu1  ;;  %v187_v9 = vmul.f32 %v518_v54, %v637_v30 }
  0xeb   :  { %v463_v60 = vpack.c.bf16 %v129_v57, %v126_v52  ;;  %v483_v61 = vpack.c.bf16 %v161_v59, %v158_v53  ;;  %v195_v11 = vmul.f32 %v526_v55, %v637_v30  ;;  %v259_v13 = vmul.f32 %v518_v54, %v644_v39 }
  0xec   :  { %492 = vst [vmem:[%s837_s4 + $0x18] sm:$0xff] %v468_v56   ;;  %496 = vst [vmem:[%s837_s4 + $0x38] sm:$0xff] %v488_v58   ;;  %v185_v15 = vmul.f32 %v637_v30, %v129_v57  ;;  %v193_v17 = vmul.f32 %v637_v30, %v161_v59  ;;  %v257_v19 = vmul.f32 %v644_v39, %v129_v57 }
  0xed   :  { %491 = vst [vmem:[%s837_s4 + $0x10] sm:$0xff] %v463_v60   ;;  %495 = vst [vmem:[%s837_s4 + $0x30] sm:$0xff] %v483_v61   ;;  %v265_v21 = vmul.f32 %v644_v39, %v161_v59  ;;  %v267_v23 = vmul.f32 %v526_v55, %v644_v39 }
  0xee   :  { %196 = vadd.xlane.f32.xlu0 %v180_v62  ;;  %274 = vadd.xlane.f32.xlu1 %v255_v63 }
  0xf2   :  { %212 = vadd.xlane.f32.xlu0 %v188_v0  ;;  %290 = vadd.xlane.f32.xlu1 %v263_v1 }
  0xf6   :  { %268 = vadd.xlane.f32.xlu0 %v252_v2  ;;  %214 = vadd.xlane.f32.xlu1 %v189_v3 }
  0xfa   :  { %284 = vadd.xlane.f32.xlu0 %v260_v4  ;;  %270 = vadd.xlane.f32.xlu1 %v253_v5 }
  0xfe   :  { %286 = vadd.xlane.f32.xlu1 %v261_v6  ;;  %198 = vadd.xlane.f32.xlu0 %v181_v7 }
 0x102   :  { %208 = vadd.xlane.f32.xlu0 %v186_v8  ;;  %210 = vadd.xlane.f32.xlu1 %v187_v9 }
 0x106   :  { %224 = vadd.xlane.f32.xlu0 %v194_v10  ;;  %226 = vadd.xlane.f32.xlu1 %v195_v11 }
 0x10a   :  { %280 = vadd.xlane.f32.xlu0 %v258_v12  ;;  %282 = vadd.xlane.f32.xlu1 %v259_v13 }
 0x10e   :  { %204 = vadd.xlane.f32.xlu0 %v184_v14  ;;  %206 = vadd.xlane.f32.xlu1 %v185_v15 }
 0x112   :  { %220 = vadd.xlane.f32.xlu0 %v192_v16  ;;  %222 = vadd.xlane.f32.xlu1 %v193_v17 }
 0x116   :  { %276 = vadd.xlane.f32.xlu0 %v256_v18  ;;  %278 = vadd.xlane.f32.xlu1 %v257_v19 }
 0x11a   :  { %292 = vadd.xlane.f32.xlu0 %v264_v20  ;;  %294 = vadd.xlane.f32.xlu1 %v265_v21 }
 0x11e   :  { %296 = vadd.xlane.f32.xlu0 %v266_v22  ;;  %298 = vadd.xlane.f32.xlu1 %v267_v23 }
 0x16f   :  { %v217_v24 = vpop.xlane.xlu0 %216  ;;  %v201_v25 = vpop.xlane.xlu1 %200 }
 0x170   :  { %239 = vst.msk [vmem:[%s838_s5 + $0x50] sm:$0xff] %vm228_vm1, %v217_v24  ;;  %231 = vst.msk [vmem:[%s838_s5 + $0x10] sm:$0xff] %vm228_vm1, %v201_v25 }
 0x173   :  { %v273_v26 = vpop.xlane.xlu0 %272  ;;  %v203_v27 = vpop.xlane.xlu1 %202 }
 0x174   :  { %302 = vst.msk [vmem:[%s839_s6 + $0x10] sm:$0xff] %vm228_vm1, %v273_v26  ;;  %232 = vst.msk [vmem:[%s838_s5 + $0x18] sm:$0xff] %vm228_vm1, %v203_v27 }
 0x177   :  { %v289_v28 = vpop.xlane.xlu0 %288  ;;  %v219_v29 = vpop.xlane.xlu1 %218 }
 0x178   :  { %310 = vst.msk [vmem:[%s839_s6 + $0x50] sm:$0xff] %vm228_vm1, %v289_v28  ;;  %240 = vst.msk [vmem:[%s838_s5 + $0x58] sm:$0xff] %vm228_vm1, %v219_v29 }
 0x17b   :  { %v197_v30 = vpop.xlane.xlu0 %196  ;;  %v275_v31 = vpop.xlane.xlu1 %274 }
 0x17c   :  { %229 = vst.msk [vmem:[%s838_s5] sm:$0xff] %vm228_vm1, %v197_v30  ;;  %303 = vst.msk [vmem:[%s839_s6 + $0x18] sm:$0xff] %vm228_vm1, %v275_v31 }
 0x17f   :  { %v213_v32 = vpop.xlane.xlu0 %212  ;;  %v291_v33 = vpop.xlane.xlu1 %290 }
 0x180   :  { %237 = vst.msk [vmem:[%s838_s5 + $0x40] sm:$0xff] %vm228_vm1, %v213_v32  ;;  %311 = vst.msk [vmem:[%s839_s6 + $0x58] sm:$0xff] %vm228_vm1, %v291_v33 }
 0x183   :  { %v269_v34 = vpop.xlane.xlu0 %268  ;;  %v215_v35 = vpop.xlane.xlu1 %214 }
 0x184   :  { %300 = vst.msk [vmem:[%s839_s6] sm:$0xff] %vm228_vm1, %v269_v34  ;;  %238 = vst.msk [vmem:[%s838_s5 + $0x48] sm:$0xff] %vm228_vm1, %v215_v35 }
 0x187   :  { %v285_v36 = vpop.xlane.xlu0 %284  ;;  %v271_v37 = vpop.xlane.xlu1 %270 }
 0x188   :  { %308 = vst.msk [vmem:[%s839_s6 + $0x40] sm:$0xff] %vm228_vm1, %v285_v36  ;;  %301 = vst.msk [vmem:[%s839_s6 + $0x8] sm:$0xff] %vm228_vm1, %v271_v37 }
 0x18b   :  { %v287_v38 = vpop.xlane.xlu1 %286  ;;  %v199_v39 = vpop.xlane.xlu0 %198 }
 0x18c   :  { %309 = vst.msk [vmem:[%s839_s6 + $0x48] sm:$0xff] %vm228_vm1, %v287_v38  ;;  %230 = vst.msk [vmem:[%s838_s5 + $0x8] sm:$0xff] %vm228_vm1, %v199_v39 }
 0x18f   :  { %v209_v40 = vpop.xlane.xlu0 %208  ;;  %v211_v41 = vpop.xlane.xlu1 %210 }
 0x190   :  { %235 = vst.msk [vmem:[%s838_s5 + $0x30] sm:$0xff] %vm228_vm1, %v209_v40  ;;  %236 = vst.msk [vmem:[%s838_s5 + $0x38] sm:$0xff] %vm228_vm1, %v211_v41 }
 0x193   :  { %v225_v42 = vpop.xlane.xlu0 %224  ;;  %v227_v43 = vpop.xlane.xlu1 %226 }
 0x194   :  { %243 = vst.msk [vmem:[%s838_s5 + $0x70] sm:$0xff] %vm228_vm1, %v225_v42  ;;  %244 = vst.msk [vmem:[%s838_s5 + $0x78] sm:$0xff] %vm228_vm1, %v227_v43 }
 0x197   :  { %v281_v44 = vpop.xlane.xlu0 %280  ;;  %v283_v45 = vpop.xlane.xlu1 %282 }
 0x198   :  { %306 = vst.msk [vmem:[%s839_s6 + $0x30] sm:$0xff] %vm228_vm1, %v281_v44  ;;  %307 = vst.msk [vmem:[%s839_s6 + $0x38] sm:$0xff] %vm228_vm1, %v283_v45 }
 0x19b   :  { %v205_v46 = vpop.xlane.xlu0 %204  ;;  %v207_v47 = vpop.xlane.xlu1 %206 }
 0x19c   :  { %233 = vst.msk [vmem:[%s838_s5 + $0x20] sm:$0xff] %vm228_vm1, %v205_v46  ;;  %234 = vst.msk [vmem:[%s838_s5 + $0x28] sm:$0xff] %vm228_vm1, %v207_v47 }
 0x19f   :  { %v221_v48 = vpop.xlane.xlu0 %220  ;;  %v223_v49 = vpop.xlane.xlu1 %222 }
 0x1a0   :  { %241 = vst.msk [vmem:[%s838_s5 + $0x60] sm:$0xff] %vm228_vm1, %v221_v48  ;;  %242 = vst.msk [vmem:[%s838_s5 + $0x68] sm:$0xff] %vm228_vm1, %v223_v49 }
 0x1a3   :  { %v277_v50 = vpop.xlane.xlu0 %276  ;;  %v279_v51 = vpop.xlane.xlu1 %278 }
 0x1a4   :  { %304 = vst.msk [vmem:[%s839_s6 + $0x20] sm:$0xff] %vm228_vm1, %v277_v50  ;;  %305 = vst.msk [vmem:[%s839_s6 + $0x28] sm:$0xff] %vm228_vm1, %v279_v51 }
 0x1a7   :  { %v293_v52 = vpop.xlane.xlu0 %292  ;;  %v295_v53 = vpop.xlane.xlu1 %294 }
 0x1a8   :  { %312 = vst.msk [vmem:[%s839_s6 + $0x60] sm:$0xff] %vm228_vm1, %v293_v52  ;;  %313 = vst.msk [vmem:[%s839_s6 + $0x68] sm:$0xff] %vm228_vm1, %v295_v53 }
 0x1ab   :  { %v297_v54 = vpop.xlane.xlu0 %296  ;;  %v299_v55 = vpop.xlane.xlu1 %298 }
 0x1ac   :  { %314 = vst.msk [vmem:[%s839_s6 + $0x70] sm:$0xff] %vm228_vm1, %v297_v54  ;;  %315 = vst.msk [vmem:[%s839_s6 + $0x78] sm:$0xff] %vm228_vm1, %v299_v55 }

// kernel: breadth_forward.3
= control target key start
LH: loop header
LB: loop body
LE: loop exit
PB: predicated region body
PF: predicated region fallthrough
CT: control target
= control target key end

     0   :  { %v1535_v0 = vmov 0   ;;  %vm25_vm0 = vcmask 7168   ;;  %v1536_v17 = vmov -1e+30   ;;  %v75_v18 = vlaneseq  ;;  %s2322_s0 = inlined_call_operand.vmem [shape: f32[128,1], index: 0, kind: input, shape index: {}]   ;;  %s2323_s2 = inlined_call_operand.vmem [shape: s8[128,128], index: 2, kind: input, shape index: {}]   ;;  %s2324_s1 = inlined_call_operand.vmem [shape: f32[1,128], index: 1, kind: input, shape index: {}]   ;;  %s2325_s3 = inlined_call_operand.vmem [shape: bf16[128,128], index: 3, kind: input, shape index: {}]   ;;  %s2326_s4 = inlined_call_operand.vmem [shape: f32[1,128], index: 4, kind: input, shape index: {}]   ;;  %s2327_s5 = inlined_call_operand.vmem [shape: f32[128,128], index: 5, kind: output, shape index: {}]  }
   0x1   :  { %1398 = vset.pattern.permute.xlu1 %v1535_v0  ;;  %1397 = vset.pattern.permute.xlu0 %v1535_v0  ;;  %v202_v1 = vld [vmem:[%s2322_s0 + $0x40] sm:$0xff]  ;;  %v203_v3 = vld [vmem:[%s2322_s0 + $0x48] sm:$0xff]  ;;  %v197_v5 = vld [vmem:[%s2322_s0 + $0x18] sm:$0xff]  ;;  %26 = vst.msk [vmem:[#allocation2] sm:$0xff] %vm25_vm0, %v1536_v17 }
   0x2   :  { %v194_v2 = vld [vmem:[%s2322_s0] sm:$0xff]  ;;  %253 = vperm.xlu1 %1398, %v202_v1   ;;  %v195_v4 = vld [vmem:[%s2322_s0 + $0x8] sm:$0xff]  ;;  %v196_v6 = vld [vmem:[%s2322_s0 + $0x10] sm:$0xff]  ;;  %27 = vst.msk [vmem:[#allocation2 + $0x8] sm:$0xff] %vm25_vm0, %v1536_v17  ;;  %v1635_v20 = vshrl.u32 %v75_v18, 7  ;;  %v1640_v23 = vand.u32 127, %v75_v18 }
   0x3   :  { %213 = vperm.xlu0 %1397, %v194_v2   ;;  %v205_v7 = vld [vmem:[%s2322_s0 + $0x58] sm:$0xff]  ;;  %v204_v8 = vld [vmem:[%s2322_s0 + $0x50] sm:$0xff]  ;;  %v199_v9 = vld [vmem:[%s2322_s0 + $0x28] sm:$0xff]  ;;  %28 = vst.msk [vmem:[#allocation2 + $0x10] sm:$0xff] %vm25_vm0, %v1536_v17 }
   0x4   :  { %v198_v10 = vld [vmem:[%s2322_s0 + $0x20] sm:$0xff]  ;;  %v207_v11 = vld [vmem:[%s2322_s0 + $0x68] sm:$0xff]  ;;  %v201_v13 = vld [vmem:[%s2322_s0 + $0x38] sm:$0xff]  ;;  %29 = vst.msk [vmem:[#allocation2 + $0x18] sm:$0xff] %vm25_vm0, %v1536_v17  ;;  %v84_v24 = vadd.s32 64, %v1635_v20  ;;  %v77_v25 = vadd.s32 8, %v1635_v20  ;;  %vm114_vm1 = vcmp.eq.s32.totalorder %v1635_v20, %v1640_v23 }
   0x5   :  { %v206_v12 = vld [vmem:[%s2322_s0 + $0x60] sm:$0xff]  ;;  %v200_v14 = vld [vmem:[%s2322_s0 + $0x30] sm:$0xff]  ;;  %v209_v15 = vld [vmem:[%s2322_s0 + $0x78] sm:$0xff]  ;;  %30 = vst.msk [vmem:[#allocation2 + $0x20] sm:$0xff] %vm25_vm0, %v1536_v17  ;;  %v85_v30 = vadd.s32 72, %v1635_v20  ;;  %v78_v33 = vadd.s32 16, %v1635_v20 }
   0x6   :  { %258 = vperm.xlu1 %1398, %v203_v3   ;;  %v208_v16 = vld [vmem:[%s2322_s0 + $0x70] sm:$0xff]  ;;  %31 = vst.msk [vmem:[#allocation2 + $0x28] sm:$0xff] %vm25_vm0, %v1536_v17  ;;  %32 = vst.msk [vmem:[#allocation2 + $0x30] sm:$0xff] %vm25_vm0, %v1536_v17  ;;  %v1292_v19 = vld [vmem:[%s2323_s2] sm:$0xff]   ;;  %vm122_vm2 = vcmp.eq.s32.totalorder %v84_v24, %v1640_v23  ;;  %vm115_vm3 = vcmp.eq.s32.totalorder %v77_v25, %v1640_v23  ;;  %v79_v39 = vadd.s32 24, %v1635_v20  ;;  %v86_v40 = vadd.s32 80, %v1635_v20 }
   0x7   :  { %218 = vperm.xlu0 %1397, %v195_v4   ;;  %33 = vst.msk [vmem:[#allocation2 + $0x38] sm:$0xff] %vm25_vm0, %v1536_v17  ;;  %34 = vst.msk [vmem:[#allocation2 + $0x40] sm:$0xff] %vm25_vm0, %v1536_v17  ;;  %v1293_v21 = vunpack.c.0.s8 %v1292_v19  ;;  %v1390_v22 = vld [vmem:[%s2323_s2 + $0x10] sm:$0xff]   ;;  %v1294_v26 = vunpack.c.1.s8 %v1292_v19  ;;  %v1297_v31 = vunpack.c.2.s8 %v1292_v19  ;;  %v1298_v36 = vunpack.c.3.s8 %v1292_v19  ;;  %v1662_v45 = vld [vmem:[%s2323_s2 + $0x8] sm:$0xff]  }
   0x8   :  { %35 = vst.msk [vmem:[#allocation2 + $0x48] sm:$0xff] %vm25_vm0, %v1536_v17  ;;  %36 = vst.msk [vmem:[#allocation2 + $0x50] sm:$0xff] %vm25_vm0, %v1536_v17  ;;  %v1309_v27 = vunpack.c.0.s8 %v1390_v22  ;;  %v1310_v28 = vunpack.c.1.s8 %v1390_v22  ;;  %v1313_v37 = vunpack.c.2.s8 %v1390_v22  ;;  %v1314_v41 = vunpack.c.3.s8 %v1390_v22  ;;  %v1667_v46 = vld [vmem:[%s2324_s1] ss:$0 sm:$0xff]  ;;  %v1690_v59 = vld [vmem:[%s2323_s2 + $0x18] sm:$0xff]  }
   0x9   :  { %37 = vst.msk [vmem:[#allocation2 + $0x58] sm:$0xff] %vm25_vm0, %v1536_v17  ;;  %38 = vst.msk [vmem:[#allocation2 + $0x60] sm:$0xff] %vm25_vm0, %v1536_v17  ;;  %v162_v29 = vcvt.s32.f32 %v1293_v21  ;;  %v163_v32 = vcvt.s32.f32 %v1294_v26  ;;  %vm123_vm4 = vcmp.eq.s32.totalorder %v85_v30, %v1640_v23  ;;  %v164_v42 = vcvt.s32.f32 %v1297_v31 }
   0xa   :  { %228 = vperm.xlu1 %1398, %v197_v5   ;;  %39 = vst.msk [vmem:[#allocation2 + $0x68] sm:$0xff] %vm25_vm0, %v1536_v17  ;;  %40 = vst.msk [vmem:[#allocation2 + $0x70] sm:$0xff] %vm25_vm0, %v1536_v17  ;;  %v170_v34 = vcvt.s32.f32 %v1309_v27  ;;  %v171_v35 = vcvt.s32.f32 %v1310_v28  ;;  %v87_v43 = vadd.s32 88, %v1635_v20  ;;  %vm116_vm5 = vcmp.eq.s32.totalorder %v78_v33, %v1640_v23 }
   0xb   :  { %223 = vperm.xlu0 %1397, %v196_v6   ;;  %41 = vst.msk [vmem:[#allocation2 + $0x78] sm:$0xff] %vm25_vm0, %v1536_v17  ;;  %v1650_v38 = vsel %vm114_vm1, 1.0, %v162_v29  ;;  %v1656_v44 = vsel %vm115_vm3, 1.0, %v163_v32  ;;  %v165_v48 = vcvt.s32.f32 %v1298_v36  ;;  %v172_v49 = vcvt.s32.f32 %v1313_v37 }
   0xc   :  { %vm361_vm6 = vcmp.gt.f32.partialorder %v1650_v38, 0.0  ;;  %v1672_v47 = vsel %vm122_vm2, 1.0, %v170_v34  ;;  %v1674_v50 = vsel %vm123_vm4, 1.0, %v171_v35  ;;  %vm117_vm7 = vcmp.eq.s32.totalorder %v79_v39, %v1640_v23 }
   0xd   :  { %vm124_vm8 = vcmp.eq.s32.totalorder %v86_v40, %v1640_v23  ;;  %v173_v51 = vcvt.s32.f32 %v1314_v41  ;;  %v1678_v54 = vsel %vm116_vm5, 1.0, %v164_v42  ;;  %vm125_vm9 = vcmp.eq.s32.totalorder %v87_v43, %v1640_v23 }
   0xe   :  { %268 = vperm.xlu1 %1398, %v205_v7   ;;  %v80_v55 = vadd.s32 32, %v1635_v20  ;;  %v1301_v56 = vunpack.c.0.s8 %v1662_v45  ;;  %vm369_vm10 = vcmp.gt.f32.partialorder %v1672_v47, 0.0  ;;  %vm362_vm11 = vcmp.gt.f32.partialorder %v1656_v44, 0.0 }
   0xf   :  { %263 = vperm.xlu0 %1397, %v204_v8   ;;  %v1692_v60 = vsel %vm117_vm7, 1.0, %v165_v48  ;;  %v1694_v61 = vsel %vm124_vm8, 1.0, %v172_v49  ;;  %v81_v62 = vadd.s32 40, %v1635_v20  ;;  %v1302_v63 = vunpack.c.1.s8 %v1662_v45 }
  0x10   :  { %vm370_vm13 = vcmp.gt.f32.partialorder %v1674_v50, 0.0  ;;  %vm363_vm14 = vcmp.gt.f32.partialorder %v1678_v54, 0.0  ;;  %v1702_v2 = vsel %vm125_vm9, 1.0, %v173_v51  ;;  %vm118_vm1 = vcmp.eq.s32.totalorder %v80_v55, %v1640_v23 }
  0x11   :  { %v166_v5 = vcvt.s32.f32 %v1301_v56  ;;  %v1317_v6 = vunpack.c.0.s8 %v1690_v59  ;;  %vm364_vm3 = vcmp.gt.f32.partialorder %v1692_v60, 0.0  ;;  %vm371_vm4 = vcmp.gt.f32.partialorder %v1694_v61, 0.0 }
  0x12   :  { %238 = vperm.xlu1 %1398, %v199_v9   ;;  %v1305_v36 = vunpack.c.2.s8 %v1662_v45  ;;  %v82_v41 = vadd.s32 48, %v1635_v20 }
  0x13   :  { %233 = vperm.xlu0 %1397, %v198_v10   ;;  %v1318_v10 = vunpack.c.1.s8 %v1690_v59  ;;  %v1720_v21 = vsel %vm118_vm1, 1.0, %v166_v5  ;;  %v174_v22 = vcvt.s32.f32 %v1317_v6  ;;  %v90_v5 = vadd.s32 112, %v1635_v20 }
  0x14   :  { %vm120_vm1 = vcmp.eq.s32.totalorder %v82_v41, %v1640_v23  ;;  %v1321_v6 = vunpack.c.2.s8 %v1690_v59 }
  0x15   :  { %v175_v27 = vcvt.s32.f32 %v1318_v10 }
  0x16   :  { %278 = vperm.xlu1 %1398, %v207_v11  }
  0x17   :  { %273 = vperm.xlu0 %1397, %v206_v12   ;;  %v167_v12 = vcvt.s32.f32 %v1302_v63 }
  0x1a   :  { %248 = vperm.xlu1 %1398, %v201_v13   ;;  %v88_v13 = vadd.s32 96, %v1635_v20 }
  0x1b   :  { %243 = vperm.xlu0 %1397, %v200_v14   ;;  %v89_v14 = vadd.s32 104, %v1635_v20 }
  0x1c   :  { %vm126_vm7 = vcmp.eq.s32.totalorder %v88_v13, %v1640_v23 }
  0x1d   :  { %vm127_vm8 = vcmp.eq.s32.totalorder %v89_v14, %v1640_v23  ;;  %v1758_v48 = vsel %vm126_vm7, 1.0, %v174_v22 }
  0x1e   :  { %288 = vperm.xlu1 %1398, %v209_v15   ;;  %v1762_v49 = vsel %vm127_vm8, 1.0, %v175_v27 }
  0x1f   :  { %283 = vperm.xlu0 %1397, %v208_v16  }
  0x81   :  { %v254_v52 = vpop.permute.xlu1 %253 }
  0x82   :  { %v214_v53 = vpop.permute.xlu0 %213  ;;  %v305_v57 = vadd.f32 %v1667_v46, %v254_v52 }
  0x83   :  { %v297_v58 = vadd.f32 %v1667_v46, %v214_v53 }
  0x84   :  { %v337_v0 = vmul.f32 0.2, %v305_v57  ;;  %vm321_vm15 = vcmp.gt.f32.partialorder %v305_v57, 0.0 }
  0x85   :  { %v329_v1 = vmul.f32 0.2, %v297_v58  ;;  %vm313_vm12 = vcmp.gt.f32.partialorder %v297_v58, 0.0  ;;  %v259_v3 = vpop.permute.xlu1 %258 }
  0x86   :  { %v219_v4 = vpop.permute.xlu0 %218  ;;  %v306_v7 = vadd.f32 %v1667_v46, %v259_v3  ;;  %v353_v17 = vsel %vm321_vm15, %v305_v57, %v337_v0  ;;  %v168_v57 = vcvt.s32.f32 %v1305_v36  ;;  %v91_v36 = vadd.s32 120, %v1635_v20 }
  0x87   :  { %v298_v8 = vadd.f32 %v1667_v46, %v219_v4  ;;  %v345_v9 = vsel %vm313_vm12, %v297_v58, %v329_v1  ;;  %v1727_v28 = vsel %vm369_vm10, %v353_v17, -1e+30  ;;  %vm372_vm10 = vcmp.gt.f32.partialorder %v1702_v2, 0.0 }
  0x88   :  { %v1711_v11 = vsel %vm361_vm6, %v345_v9, -1e+30  ;;  %v338_v15 = vmul.f32 0.2, %v306_v7  ;;  %vm322_vm5 = vcmp.gt.f32.partialorder %v306_v7, 0.0  ;;  %vm119_vm6 = vcmp.eq.s32.totalorder %v81_v62, %v1640_v23 }
  0x89   :  { %v330_v16 = vmul.f32 0.2, %v298_v8  ;;  %409 = vmax.xlane.f32.xlu0 %v1711_v11  ;;  %vm314_vm2 = vcmp.gt.f32.partialorder %v298_v8, 0.0  ;;  %v229_v18 = vpop.permute.xlu1 %228  ;;  %v1742_v35 = vsel %vm119_vm6, 1.0, %v167_v12  ;;  %v83_v58 = vadd.s32 56, %v1635_v20 }
  0x8a   :  { %v224_v19 = vpop.permute.xlu0 %223  ;;  %v300_v24 = vadd.f32 %v1667_v46, %v229_v18  ;;  %v354_v32 = vsel %vm322_vm5, %v306_v7, %v338_v15  ;;  %v1306_v62 = vunpack.c.3.s8 %v1662_v45  ;;  %vm373_vm5 = vcmp.gt.f32.partialorder %v1758_v48, 0.0 }
  0x8b   :  { %v299_v25 = vadd.f32 %v1667_v46, %v224_v19  ;;  %v346_v26 = vsel %vm314_vm2, %v298_v8, %v330_v16  ;;  %v1750_v42 = vsel %vm370_vm13, %v354_v32, -1e+30  ;;  %v1792_v16 = vsel %vm120_vm1, 1.0, %v168_v57 }
  0x8c   :  { %v1731_v29 = vsel %vm362_vm11, %v346_v26, -1e+30  ;;  %v332_v30 = vmul.f32 0.2, %v300_v24  ;;  %vm316_vm12 = vcmp.gt.f32.partialorder %v300_v24, 0.0  ;;  %vm365_vm11 = vcmp.gt.f32.partialorder %v1720_v21, 0.0 }
  0x8d   :  { %v331_v31 = vmul.f32 0.2, %v299_v25  ;;  %425 = vmax.xlane.f32.xlu0 %v1727_v28  ;;  %411 = vmax.xlane.f32.xlu1 %v1731_v29  ;;  %vm315_vm9 = vcmp.gt.f32.partialorder %v299_v25, 0.0  ;;  %v269_v33 = vpop.permute.xlu1 %268  ;;  %v169_v12 = vcvt.s32.f32 %v1306_v62  ;;  %vm128_vm6 = vcmp.eq.s32.totalorder %v90_v5, %v1640_v23 }
  0x8e   :  { %v264_v34 = vpop.permute.xlu0 %263  ;;  %v308_v37 = vadd.f32 %v1667_v46, %v269_v33  ;;  %v348_v53 = vsel %vm316_vm12, %v300_v24, %v332_v30  ;;  %v176_v19 = vcvt.s32.f32 %v1321_v6 }
  0x8f   :  { %v307_v39 = vadd.f32 %v1667_v46, %v264_v34  ;;  %v347_v40 = vsel %vm315_vm9, %v299_v25, %v331_v31  ;;  %v1775_v3 = vsel %vm364_vm3, %v348_v53, -1e+30  ;;  %vm374_vm9 = vcmp.gt.f32.partialorder %v1762_v49, 0.0 }
  0x90   :  { %v1754_v43 = vsel %vm363_vm14, %v347_v40, -1e+30  ;;  %v340_v51 = vmul.f32 0.2, %v308_v37  ;;  %vm366_vm14 = vcmp.gt.f32.partialorder %v1742_v35, 0.0  ;;  %vm324_vm15 = vcmp.gt.f32.partialorder %v308_v37, 0.0 }
  0x91   :  { %v339_v52 = vmul.f32 0.2, %v307_v39  ;;  %427 = vmax.xlane.f32.xlu0 %v1750_v42  ;;  %413 = vmax.xlane.f32.xlu1 %v1754_v43  ;;  %vm323_vm13 = vcmp.gt.f32.partialorder %v307_v39, 0.0  ;;  %v239_v55 = vpop.permute.xlu1 %238  ;;  %v1322_v31 = vunpack.c.3.s8 %v1690_v59  ;;  %v1826_v59 = vsel %vm128_vm6, 1.0, %v176_v19  ;;  %v2024_v19 = vld [vmem:[#allocation2 + $0x38] sm:$0xff] }
  0x92   :  { %v234_v56 = vpop.permute.xlu0 %233  ;;  %v302_v63 = vadd.f32 %v1667_v46, %v239_v55  ;;  %v356_v8 = vsel %vm324_vm15, %v308_v37, %v340_v51  ;;  %vm375_vm15 = vcmp.gt.f32.partialorder %v1826_v59, 0.0 }
  0x93   :  { %v301_v0 = vadd.f32 %v1667_v46, %v234_v56  ;;  %v355_v1 = vsel %vm323_vm13, %v307_v39, %v339_v52  ;;  %v1796_v17 = vsel %vm372_vm10, %v356_v8, -1e+30  ;;  %vm367_vm10 = vcmp.gt.f32.partialorder %v1792_v16, 0.0 }
  0x94   :  { %v1779_v4 = vsel %vm371_vm4, %v355_v1, -1e+30  ;;  %v334_v45 = vmul.f32 0.2, %v302_v63  ;;  %vm318_vm3 = vcmp.gt.f32.partialorder %v302_v63, 0.0  ;;  %vm121_vm4 = vcmp.eq.s32.totalorder %v83_v58, %v1640_v23 }
  0x95   :  { %v333_v7 = vmul.f32 0.2, %v301_v0  ;;  %415 = vmax.xlane.f32.xlu0 %v1775_v3  ;;  %429 = vmax.xlane.f32.xlu1 %v1779_v4  ;;  %vm317_vm2 = vcmp.gt.f32.partialorder %v301_v0, 0.0  ;;  %v279_v9 = vpop.permute.xlu1 %278  ;;  %v1809_v30 = vsel %vm121_vm4, 1.0, %v169_v12  ;;  %v177_v53 = vcvt.s32.f32 %v1322_v31  ;;  %v1907_v31 = vld [vmem:[#allocation2 + $0x10] sm:$0xff] }
  0x96   :  { %v274_v10 = vpop.permute.xlu0 %273  ;;  %v310_v13 = vadd.f32 %v1667_v46, %v279_v9  ;;  %v350_v25 = vsel %vm318_vm3, %v302_v63, %v334_v45  ;;  %vm368_vm13 = vcmp.gt.f32.partialorder %v1809_v30, 0.0  ;;  %v1537_v1 = vmov 0.0   ;;  %v1399_v9 = vld [vmem:[%s2325_s3] sm:$0xff]  }
  0x97   :  { %v309_v14 = vadd.f32 %v1667_v46, %v274_v10  ;;  %v349_v15 = vsel %vm317_vm2, %v301_v0, %v333_v7  ;;  %v1817_v37 = vsel %vm366_vm14, %v350_v25, -1e+30  ;;  %vm129_vm14 = vcmp.eq.s32.totalorder %v91_v36, %v1640_v23  ;;  %42 = vst.msk [vmem:[#allocation3] sm:$0xff] %vm25_vm0, %v1537_v1  ;;  %43 = vst.msk [vmem:[#allocation3 + $0x8] sm:$0xff] %vm25_vm0, %v1537_v1  ;;  %v1884_v10 = vld [vmem:[#allocation2] sm:$0xff] }
  0x98   :  { %v1800_v18 = vsel %vm365_vm11, %v349_v15, -1e+30  ;;  %v342_v22 = vmul.f32 0.2, %v310_v13  ;;  %vm326_vm8 = vcmp.gt.f32.partialorder %v310_v13, 0.0  ;;  %44 = vst.msk [vmem:[#allocation3 + $0x10] sm:$0xff] %vm25_vm0, %v1537_v1  ;;  %1339 = vmatprep.subr.bf16.mxu0 %v1399_v9  ;;  %1371 = vmatprep.subr.bf16.mxu1 %v1399_v9 }
  0x99   :  { %v341_v24 = vmul.f32 0.2, %v309_v14  ;;  %431 = vmax.xlane.f32.xlu0 %v1796_v17  ;;  %417 = vmax.xlane.f32.xlu1 %v1800_v18  ;;  %vm325_vm7 = vcmp.gt.f32.partialorder %v309_v14, 0.0  ;;  %v249_v26 = vpop.permute.xlu1 %248  ;;  %45 = vst.msk [vmem:[#allocation3 + $0x18] sm:$0xff] %vm25_vm0, %v1537_v1  ;;  %46 = vst.msk [vmem:[#allocation3 + $0x20] sm:$0xff] %vm25_vm0, %v1537_v1  ;;  %v1864_v5 = vsel %vm129_vm14, 1.0, %v177_v53 }
  0x9a   :  { %v244_v27 = vpop.permute.xlu0 %243  ;;  %v304_v32 = vadd.f32 %v1667_v46, %v249_v26  ;;  %v358_v20 = vsel %vm326_vm8, %v310_v13, %v342_v22  ;;  %47 = vst.msk [vmem:[#allocation3 + $0x28] sm:$0xff] %vm25_vm0, %v1537_v1  ;;  %48 = vst.msk [vmem:[#allocation3 + $0x30] sm:$0xff] %vm25_vm0, %v1537_v1  ;;  %vm376_vm3 = vcmp.gt.f32.partialorder %v1864_v5, 0.0  ;;  %1340 = vmatpush3.bf16.msra.mxu0 %v1399_v9  ;;  %1379 = vmatpush3.bf16.msra.mxu1 %v1399_v9  ;;  %v1891_v15 = vld [vmem:[#allocation2 + $0x40] sm:$0xff]  ;;  %v1932_v53 = vld [vmem:[#allocation2 + $0x18] sm:$0xff] }
  0x9b   :  { %v303_v33 = vadd.f32 %v1667_v46, %v244_v27  ;;  %v357_v34 = vsel %vm325_vm7, %v309_v14, %v341_v24  ;;  %v1837_v58 = vsel %vm374_vm9, %v358_v20, -1e+30  ;;  %49 = vst.msk [vmem:[#allocation3 + $0x38] sm:$0xff] %vm25_vm0, %v1537_v1  ;;  %50 = vst.msk [vmem:[#allocation3 + $0x40] sm:$0xff] %vm25_vm0, %v1537_v1  ;;  %v1889_v14 = vld [vmem:[#allocation2 + $0x8] sm:$0xff] }
  0x9c   :  { %v1821_v39 = vsel %vm373_vm5, %v357_v34, -1e+30  ;;  %v336_v40 = vmul.f32 0.2, %v304_v32  ;;  %vm320_vm11 = vcmp.gt.f32.partialorder %v304_v32, 0.0  ;;  %51 = vst.msk [vmem:[#allocation3 + $0x48] sm:$0xff] %vm25_vm0, %v1537_v1 }
  0x9d   :  { %v335_v41 = vmul.f32 0.2, %v303_v33  ;;  %419 = vmax.xlane.f32.xlu0 %v1817_v37  ;;  %433 = vmax.xlane.f32.xlu1 %v1821_v39  ;;  %vm319_vm12 = vcmp.gt.f32.partialorder %v303_v33, 0.0  ;;  %v289_v51 = vpop.permute.xlu1 %288  ;;  %52 = vst.msk [vmem:[#allocation3 + $0x50] sm:$0xff] %vm25_vm0, %v1537_v1  ;;  %53 = vst.msk [vmem:[#allocation3 + $0x58] sm:$0xff] %vm25_vm0, %v1537_v1  ;;  %v1400_v27 = vld [vmem:[%s2325_s3 + $0x8] sm:$0xff]  }
  0x9e   :  { %v284_v52 = vpop.permute.xlu0 %283  ;;  %v312_v55 = vadd.f32 %v1667_v46, %v289_v51  ;;  %54 = vst.msk [vmem:[#allocation3 + $0x60] sm:$0xff] %vm25_vm0, %v1537_v1  ;;  %55 = vst.msk [vmem:[#allocation3 + $0x68] sm:$0xff] %vm25_vm0, %v1537_v1  ;;  %1341 = vmatprep.subr.bf16.mxu0 %v1400_v27  ;;  %1372 = vmatprep.subr.bf16.mxu1 %v1400_v27  ;;  %v1401_v51 = vld [vmem:[%s2325_s3 + $0x10] sm:$0xff]  }
  0x9f   :  { %v311_v56 = vadd.f32 %v1667_v46, %v284_v52  ;;  %v351_v57 = vsel %vm319_vm12, %v303_v33, %v335_v41  ;;  %v352_v46 = vsel %vm320_vm11, %v304_v32, %v336_v40  ;;  %56 = vst.msk [vmem:[#allocation3 + $0x70] sm:$0xff] %vm25_vm0, %v1537_v1  ;;  %57 = vst.msk [vmem:[#allocation3 + $0x78] sm:$0xff] %vm25_vm0, %v1537_v1  ;;  %v1909_v32 = vld [vmem:[#allocation2 + $0x48] sm:$0xff]  ;;  %1342 = vmatpush3.bf16.msra.mxu0 %v1400_v27  ;;  %v1930_v52 = vld [vmem:[#allocation2 + $0x50] sm:$0xff] }
  0xa0   :  { %v1841_v62 = vsel %vm367_vm10, %v351_v57, -1e+30  ;;  %v344_v63 = vmul.f32 0.2, %v312_v55  ;;  %vm328_vm2 = vcmp.gt.f32.partialorder %v312_v55, 0.0  ;;  %2342 = vst [vmem:[#allocation5_spill] sm:$0xff] %v1909_v32  ;;  %1380 = vmatpush3.bf16.msra.mxu1 %v1400_v27  ;;  %1343 = vmatprep.subr.bf16.mxu0 %v1401_v51 }
  0xa1   :  { %v343_v0 = vmul.f32 0.2, %v311_v56  ;;  %435 = vmax.xlane.f32.xlu0 %v1837_v58  ;;  %421 = vmax.xlane.f32.xlu1 %v1841_v62  ;;  %vm327_vm1 = vcmp.gt.f32.partialorder %v311_v56, 0.0  ;;  %v1869_v45 = vsel %vm368_vm13, %v352_v46, -1e+30  ;;  %2344 = vst [vmem:[#allocation7_spill] sm:$0xff] %v1930_v52 }
  0xa2   :  { %v360_v8 = vsel %vm328_vm2, %v312_v55, %v344_v63  ;;  %1373 = vmatprep.subr.bf16.mxu1 %v1401_v51  ;;  %v1402_v1 = vld [vmem:[%s2325_s3 + $0x18] sm:$0xff]   ;;  %v1999_v34 = vld [vmem:[#allocation2 + $0x30] sm:$0xff] }
  0xa3   :  { %v359_v6 = vsel %vm327_vm1, %v311_v56, %v343_v0  ;;  %v1878_v23 = vsel %vm376_vm3, %v360_v8, -1e+30  ;;  %1344 = vmatpush3.bf16.msra.mxu0 %v1401_v51  ;;  %v1955_v8 = vld [vmem:[#allocation2 + $0x58] sm:$0xff]  ;;  %v2022_v55 = vld [vmem:[#allocation2 + $0x70] sm:$0xff] }
  0xa4   :  { %v1873_v7 = vsel %vm375_vm15, %v359_v6, -1e+30  ;;  %1381 = vmatpush3.bf16.msra.mxu1 %v1401_v51  ;;  %v1953_v6 = vld [vmem:[#allocation2 + $0x20] sm:$0xff]  ;;  %2346 = vst [vmem:[#allocation9_spill] sm:$0xff] %v1955_v8  ;;  %1345 = vmatprep.subr.bf16.mxu0 %v1402_v1  ;;  %2352 = vst [vmem:[#allocation15_spill] sm:$0xff] %v2022_v55 }
  0xa5   :  { %423 = vmax.xlane.f32.xlu0 %v1869_v45  ;;  %437 = vmax.xlane.f32.xlu1 %v1873_v7  ;;  %v1976_v51 = vld [vmem:[#allocation2 + $0x60] sm:$0xff] }
  0xa6   :  { %1374 = vmatprep.subr.bf16.mxu1 %v1402_v1  ;;  %2348 = vst [vmem:[#allocation11_spill] sm:$0xff] %v1976_v51 }
  0xa7   :  { %1346 = vmatpush3.bf16.msra.mxu0 %v1402_v1 }
  0xa8   :  { %1382 = vmatpush3.bf16.msra.mxu1 %v1402_v1 }
  0xa9   :  { %439 = vmax.xlane.f32.xlu0 %v1878_v23 }
 0x116   :  { %v410_v12 = vpop.xlane.xlu0 %409 }
 0x117   :  { %v1887_v13 = vmax.f32 %v1884_v10, %v410_v12 }
 0x119   :  { %1059 = vst.msk [vmem:[#allocation2] sm:$0xff] %vm25_vm0, %v1887_v13  ;;  %507 = vperm.xlu1 %1398, %v1887_v13  }
 0x11a   :  { %v412_v22 = vpop.xlane.xlu1 %411  ;;  %v426_v24 = vpop.xlane.xlu0 %425 }
 0x11b   :  { %v1899_v25 = vmax.f32 %v1889_v14, %v412_v22  ;;  %v1902_v26 = vmax.f32 %v1891_v15, %v426_v24 }
 0x11d   :  { %1060 = vst.msk [vmem:[#allocation2 + $0x8] sm:$0xff] %vm25_vm0, %v1899_v25  ;;  %1067 = vst.msk [vmem:[#allocation2 + $0x40] sm:$0xff] %vm25_vm0, %v1902_v26  ;;  %512 = vperm.xlu0 %1397, %v1899_v25   ;;  %547 = vperm.xlu1 %1398, %v1902_v26  }
 0x11e   :  { %v414_v36 = vpop.xlane.xlu1 %413  ;;  %v428_v40 = vpop.xlane.xlu0 %427 }
 0x11f   :  { %v1922_v41 = vmax.f32 %v1907_v31, %v414_v36  ;;  %v1925_v20 = vmax.f32 %v1909_v32, %v428_v40  ;;  %v1403_v40 = vld [vmem:[%s2325_s3 + $0x20] sm:$0xff]  }
 0x120   :  { %1347 = vmatprep.subr.bf16.mxu0 %v1403_v40  ;;  %1375 = vmatprep.subr.bf16.mxu1 %v1403_v40 }
 0x121   :  { %2343 = vst [vmem:[#allocation6_spill] sm:$0xff] %v1925_v20  ;;  %1061 = vst.msk [vmem:[#allocation2 + $0x10] sm:$0xff] %vm25_vm0, %v1922_v41  ;;  %517 = vperm.xlu0 %1397, %v1922_v41   ;;  %552 = vperm.xlu1 %1398, %v1925_v20  }
 0x122   :  { %1068 = vst.msk [vmem:[#allocation2 + $0x48] sm:$0xff] %vm25_vm0, %v1925_v20  ;;  %v430_v57 = vpop.xlane.xlu1 %429  ;;  %v416_v63 = vpop.xlane.xlu0 %415  ;;  %1348 = vmatpush3.bf16.msra.mxu0 %v1403_v40  ;;  %1383 = vmatpush3.bf16.msra.mxu1 %v1403_v40 }
 0x123   :  { %v1945_v0 = vmax.f32 %v1930_v52, %v430_v57  ;;  %v1948_v46 = vmax.f32 %v1932_v53, %v416_v63  ;;  %v1978_v57 = vld [vmem:[#allocation2 + $0x28] sm:$0xff] }
 0x124   :  { %v2001_v63 = vld [vmem:[#allocation2 + $0x68] sm:$0xff] }
 0x125   :  { %2345 = vst [vmem:[#allocation8_spill] sm:$0xff] %v1945_v0  ;;  %1069 = vst.msk [vmem:[#allocation2 + $0x50] sm:$0xff] %vm25_vm0, %v1945_v0  ;;  %557 = vperm.xlu0 %1397, %v1945_v0   ;;  %522 = vperm.xlu1 %1398, %v1948_v46  }
 0x126   :  { %1062 = vst.msk [vmem:[#allocation2 + $0x18] sm:$0xff] %vm25_vm0, %v1948_v46  ;;  %v418_v22 = vpop.xlane.xlu1 %417  ;;  %v432_v24 = vpop.xlane.xlu0 %431  ;;  %2350 = vst [vmem:[#allocation13_spill] sm:$0xff] %v2001_v63 }
 0x127   :  { %v1968_v27 = vmax.f32 %v1953_v6, %v418_v22  ;;  %v1971_v36 = vmax.f32 %v1955_v8, %v432_v24  ;;  %v1404_v22 = vld [vmem:[%s2325_s3 + $0x28] sm:$0xff]  }
 0x128   :  { %1349 = vmatprep.subr.bf16.mxu0 %v1404_v22  ;;  %1376 = vmatprep.subr.bf16.mxu1 %v1404_v22 }
 0x129   :  { %2347 = vst [vmem:[#allocation10_spill] sm:$0xff] %v1971_v36  ;;  %1063 = vst.msk [vmem:[#allocation2 + $0x20] sm:$0xff] %vm25_vm0, %v1968_v27  ;;  %527 = vperm.xlu0 %1397, %v1968_v27   ;;  %562 = vperm.xlu1 %1398, %v1971_v36  }
 0x12a   :  { %1070 = vst.msk [vmem:[#allocation2 + $0x58] sm:$0xff] %vm25_vm0, %v1971_v36  ;;  %v434_v1 = vpop.xlane.xlu1 %433  ;;  %v420_v24 = vpop.xlane.xlu0 %419  ;;  %1350 = vmatpush3.bf16.msra.mxu0 %v1404_v22  ;;  %1384 = vmatpush3.bf16.msra.mxu1 %v1404_v22 }
 0x12b   :  { %v1991_v9 = vmax.f32 %v1976_v51, %v434_v1  ;;  %v1994_v56 = vmax.f32 %v1978_v57, %v420_v24  ;;  %v1405_v1 = vld [vmem:[%s2325_s3 + $0x30] sm:$0xff]  }
 0x12c   :  { %1351 = vmatprep.subr.bf16.mxu0 %v1405_v1  ;;  %1377 = vmatprep.subr.bf16.mxu1 %v1405_v1 }
 0x12d   :  { %2349 = vst [vmem:[#allocation12_spill] sm:$0xff] %v1991_v9  ;;  %1071 = vst.msk [vmem:[#allocation2 + $0x60] sm:$0xff] %vm25_vm0, %v1991_v9  ;;  %567 = vperm.xlu0 %1397, %v1991_v9   ;;  %532 = vperm.xlu1 %1398, %v1994_v56  }
 0x12e   :  { %1064 = vst.msk [vmem:[#allocation2 + $0x28] sm:$0xff] %vm25_vm0, %v1994_v56  ;;  %v422_v40 = vpop.xlane.xlu1 %421  ;;  %v436_v24 = vpop.xlane.xlu0 %435  ;;  %1352 = vmatpush3.bf16.msra.mxu0 %v1405_v1  ;;  %1385 = vmatpush3.bf16.msra.mxu1 %v1405_v1 }
 0x12f   :  { %v2014_v33 = vmax.f32 %v1999_v34, %v422_v40  ;;  %v2017_v12 = vmax.f32 %v2001_v63, %v436_v24  ;;  %v1406_v40 = vld [vmem:[%s2325_s3 + $0x38] sm:$0xff]  }
 0x130   :  { %v2045_v63 = vld [vmem:[#allocation2 + $0x78] sm:$0xff]  ;;  %1353 = vmatprep.subr.bf16.mxu0 %v1406_v40  ;;  %1378 = vmatprep.subr.bf16.mxu1 %v1406_v40 }
 0x131   :  { %2351 = vst [vmem:[#allocation14_spill] sm:$0xff] %v2017_v12  ;;  %1065 = vst.msk [vmem:[#allocation2 + $0x30] sm:$0xff] %vm25_vm0, %v2014_v33  ;;  %537 = vperm.xlu0 %1397, %v2014_v33   ;;  %572 = vperm.xlu1 %1398, %v2017_v12  }
 0x132   :  { %1072 = vst.msk [vmem:[#allocation2 + $0x68] sm:$0xff] %vm25_vm0, %v2017_v12  ;;  %v438_v22 = vpop.xlane.xlu1 %437  ;;  %v424_v24 = vpop.xlane.xlu0 %423  ;;  %2354 = vst [vmem:[#allocation17_spill] sm:$0xff] %v2045_v63  ;;  %1354 = vmatpush3.bf16.msra.mxu0 %v1406_v40  ;;  %1386 = vmatpush3.bf16.msra.mxu1 %v1406_v40 }
 0x133   :  { %v2037_v51 = vmax.f32 %v2022_v55, %v438_v22  ;;  %v2040_v9 = vmax.f32 %v2024_v19, %v424_v24 }
 0x135   :  { %2353 = vst [vmem:[#allocation16_spill] sm:$0xff] %v2037_v51  ;;  %1073 = vst.msk [vmem:[#allocation2 + $0x70] sm:$0xff] %vm25_vm0, %v2037_v51  ;;  %577 = vperm.xlu0 %1397, %v2037_v51   ;;  %542 = vperm.xlu1 %1398, %v2040_v9  }
 0x136   :  { %1066 = vst.msk [vmem:[#allocation2 + $0x38] sm:$0xff] %vm25_vm0, %v2040_v9  ;;  %v440_v24 = vpop.xlane.xlu0 %439 }
 0x137   :  { %v2058_v1 = vmax.f32 %v2045_v63, %v440_v24 }
 0x139   :  { %2355 = vst [vmem:[#allocation18_spill] sm:$0xff] %v2058_v1  ;;  %1074 = vst.msk [vmem:[#allocation2 + $0x78] sm:$0xff] %vm25_vm0, %v2058_v1  ;;  %582 = vperm.xlu1 %1398, %v2058_v1  }
 0x198   :  { %v508_v22 = vpop.permute.xlu1 %507 }
 0x199   :  { %v585_v51 = vsub.f32 %v1711_v11, %v508_v22 }
 0x19b   :  { %v601_v55 = vmul.f32 1.442695, %v585_v51 }
 0x19c   :  { %v548_v36 = vpop.permute.xlu1 %547  ;;  %v513_v8 = vpop.permute.xlu0 %512 }
 0x19d   :  { %1407 = vpow2.f32 %v601_v55  ;;  %v593_v24 = vsub.f32 %v1727_v28, %v548_v36  ;;  %v586_v0 = vsub.f32 %v1731_v29, %v513_v8 }
 0x19f   :  { %v617_v40 = vmul.f32 1.442695, %v593_v24  ;;  %v603_v52 = vmul.f32 1.442695, %v586_v0 }
 0x1a0   :  { %v553_v20 = vpop.permute.xlu1 %552  ;;  %v518_v12 = vpop.permute.xlu0 %517 }
 0x1a1   :  { %v594_v63 = vsub.f32 %v1750_v42, %v553_v20  ;;  %v587_v32 = vsub.f32 %v1754_v43, %v518_v12  ;;  %1409 = vpow2.f32 %v603_v52 }
 0x1a2   :  { %1411 = vpow2.f32 %v617_v40 }
 0x1a3   :  { %v619_v1 = vmul.f32 1.442695, %v594_v63  ;;  %v605_v11 = vmul.f32 1.442695, %v587_v32 }
 0x1a4   :  { %v523_v51 = vpop.permute.xlu1 %522  ;;  %v558_v22 = vpop.permute.xlu0 %557 }
 0x1a5   :  { %1413 = vpow2.f32 %v619_v1  ;;  %v588_v55 = vsub.f32 %v1775_v3, %v523_v51  ;;  %v595_v28 = vsub.f32 %v1779_v4, %v558_v22 }
 0x1a6   :  { %1415 = vpow2.f32 %v605_v11 }
 0x1a7   :  { %v1408_v29 = vpop.eup %1407  ;;  %v607_v0 = vmul.f32 1.442695, %v588_v55  ;;  %v621_v8 = vmul.f32 1.442695, %v595_v28 }
 0x1a8   :  { %v563_v36 = vpop.permute.xlu1 %562  ;;  %v528_v24 = vpop.permute.xlu0 %527  ;;  %v633_v42 = vmul.f32 %v1408_v29, %v1650_v38 }
 0x1a9   :  { %1417 = vpow2.f32 %v607_v0  ;;  %v596_v43 = vsub.f32 %v1796_v17, %v563_v36  ;;  %v589_v32 = vsub.f32 %v1800_v18, %v528_v24 }
 0x1aa   :  { %681 = vadd.xlane.f32.xlu0 %v633_v42  ;;  %1419 = vpow2.f32 %v621_v8 }
 0x1ab   :  { %v623_v20 = vmul.f32 1.442695, %v596_v43  ;;  %v609_v52 = vmul.f32 1.442695, %v589_v32  ;;  %v1410_v3 = vpop.eup %1409 }
 0x1ac   :  { %v533_v12 = vpop.permute.xlu1 %532  ;;  %v568_v4 = vpop.permute.xlu0 %567  ;;  %v634_v38 = vmul.f32 %v1410_v3, %v1656_v44 }
 0x1ad   :  { %v1412_v63 = vpop.eup %1411  ;;  %1421 = vpow2.f32 %v623_v20  ;;  %v590_v1 = vsub.f32 %v1817_v37, %v533_v12  ;;  %v597_v40 = vsub.f32 %v1821_v39, %v568_v4 }
 0x1ae   :  { %1423 = vpow2.f32 %v609_v52  ;;  %683 = vadd.xlane.f32.xlu1 %v634_v38  ;;  %v858_v18 = vpack.c.bf16 %v634_v38, %v633_v42  ;;  %v641_v29 = vmul.f32 %v1412_v63, %v1672_v47 }
 0x1af   :  { %v1414_v11 = vpop.eup %1413  ;;  %v611_v17 = vmul.f32 1.442695, %v590_v1  ;;  %v625_v51 = vmul.f32 1.442695, %v597_v40 }
 0x1b0   :  { %v1416_v22 = vpop.eup %1415  ;;  %v573_v55 = vpop.permute.xlu1 %572  ;;  %v2080_v0 = vmul.f32 %v1414_v11, %v1674_v50  ;;  %1355 = vmatprep.mubr.bf16.mxu0 %v858_v18 }
 0x1b1   :  { %v538_v28 = vpop.permute.xlu0 %537  ;;  %1425 = vpow2.f32 %v611_v17  ;;  %v598_v37 = vsub.f32 %v1837_v58, %v573_v55  ;;  %v635_v39 = vmul.f32 %v1416_v22, %v1678_v54 }
 0x1b2   :  { %v591_v44 = vsub.f32 %v1841_v62, %v538_v28  ;;  %v862_v8 = vpack.c.bf16 %v2080_v0, %v641_v29  ;;  %1427 = vpow2.f32 %v625_v51 }
 0x1b3   :  { %v1418_v36 = vpop.eup %1417  ;;  %v627_v24 = vmul.f32 1.442695, %v598_v37  ;;  %685 = vadd.xlane.f32.xlu0 %v635_v39 }
 0x1b4   :  { %v613_v42 = vmul.f32 1.442695, %v591_v44  ;;  %1363 = vmatprep.mubr.bf16.mxu1 %v862_v8  ;;  %v543_v47 = vpop.permute.xlu1 %542  ;;  %v636_v50 = vmul.f32 %v1418_v36, %v1692_v60  ;;  %v1420_v32 = vpop.eup %1419  ;;  %v2359_v8 = vsub.f32 %v1932_v53, %v1948_v46  ;;  %v2363_v53 = vsub.f32 %v2024_v19, %v2040_v9  ;;  %v2371_v9 = vld [vmem:[#allocation9_spill] sm:$0xff] }
 0x1b5   :  { %v578_v43 = vpop.permute.xlu0 %577  ;;  %1429 = vpow2.f32 %v627_v24  ;;  %v592_v58 = vsub.f32 %v1869_v45, %v543_v47  ;;  %v643_v63 = vmul.f32 %v1420_v32, %v1694_v61  ;;  %v2361_v24 = vsub.f32 %v1978_v57, %v1994_v56  ;;  %v2365_v56 = vld [vmem:[#allocation5_spill] sm:$0xff]  ;;  %v2366_v57 = vld [vmem:[#allocation6_spill] sm:$0xff]  ;;  %v2369_v32 = vld [vmem:[#allocation8_spill] sm:$0xff] }
 0x1b6   :  { %v599_v62 = vsub.f32 %v1873_v7, %v578_v43  ;;  %1431 = vpow2.f32 %v613_v42  ;;  %v859_v54 = vpack.c.bf16 %v636_v50, %v635_v39  ;;  %v479_v36 = vmul.f32 1.442695, %v2359_v8 }
 0x1b7   :  { %v1422_v20 = vpop.eup %1421  ;;  %v615_v52 = vmul.f32 1.442695, %v592_v58  ;;  %687 = vadd.xlane.f32.xlu0 %v636_v50  ;;  %v487_v46 = vmul.f32 1.442695, %v2363_v53  ;;  %v2367_v47 = vsub.f32 %v2365_v56, %v2366_v57  ;;  %v2368_v50 = vld [vmem:[#allocation7_spill] sm:$0xff] }
 0x1b8   :  { %v629_v3 = vmul.f32 1.442695, %v599_v62  ;;  %v1424_v12 = vpop.eup %1423  ;;  %v583_v4 = vpop.permute.xlu1 %582  ;;  %1356 = vmatmul.mubr.bf16.vlgmr.msra.gmra.mrb[0].mxu0 %v859_v54  ;;  %v644_v1 = vmul.f32 %v1422_v20, %v1702_v2  ;;  %v2370_v58 = vsub.f32 %v2368_v50, %v2369_v32 }
 0x1b9   :  { %1433 = vpow2.f32 %v615_v52  ;;  %v600_v60 = vsub.f32 %v1878_v23, %v583_v4  ;;  %v637_v45 = vmul.f32 %v1424_v12, %v1720_v21  ;;  %v491_v43 = vmul.f32 1.442695, %v2367_v47  ;;  %v2374_v52 = vld [vmem:[#allocation11_spill] sm:$0xff] }
 0x1ba   :  { %v863_v40 = vpack.c.bf16 %v644_v1, %v643_v63  ;;  %1435 = vpow2.f32 %v629_v3  ;;  %v493_v19 = vmul.f32 1.442695, %v2370_v58  ;;  %v2375_v3 = vld [vmem:[#allocation12_spill] sm:$0xff] }
 0x1bb   :  { %v1426_v7 = vpop.eup %1425  ;;  %v631_v38 = vmul.f32 1.442695, %v600_v60  ;;  %689 = vadd.xlane.f32.xlu1 %v637_v45  ;;  %v2376_v12 = vsub.f32 %v2374_v52, %v2375_v3 }
 0x1bc   :  { %1364 = vmatmul.mubr.bf16.vlgmr.msra.gmra.mrb[0].mxu1 %v863_v40  ;;  %v638_v11 = vmul.f32 %v1426_v7, %v1742_v35  ;;  %v1428_v17 = vpop.eup %1427 }
 0x1bd   :  { %1437 = vpow2.f32 %v631_v38  ;;  %v645_v2 = vmul.f32 %v1428_v17, %v1758_v48  ;;  %v497_v4 = vmul.f32 1.442695, %v2376_v12  ;;  %v2380_v38 = vld [vmem:[#allocation15_spill] sm:$0xff]  ;;  %v658_v12 = vld [vmem:[#allocation3 + $0x48] sm:$0xff] }
 0x1be   :  { %691 = vadd.xlane.f32.xlu0 %v638_v11  ;;  %v860_v51 = vpack.c.bf16 %v638_v11, %v637_v45  ;;  %v2381_v11 = vld [vmem:[#allocation16_spill] sm:$0xff] }
 0x1bf   :  { %v1430_v61 = vpop.eup %1429  ;;  %v2382_v17 = vsub.f32 %v2380_v38, %v2381_v11 }
 0x1c0   :  { %v1432_v18 = vpop.eup %1431  ;;  %1359 = vmatprep.mubr.bf16.mxu0 %v860_v51  ;;  %v646_v23 = vmul.f32 %v1430_v61, %v1762_v49  ;;  %v2383_v61 = vld [vmem:[#allocation17_spill] sm:$0xff] }
 0x1c1   :  { %v639_v21 = vmul.f32 %v1432_v18, %v1792_v16  ;;  %v2356_v16 = vsub.f32 %v1884_v10, %v1887_v13  ;;  %v2360_v10 = vsub.f32 %v1953_v6, %v1968_v27  ;;  %v2364_v6 = vsub.f32 %v1891_v15, %v1902_v26  ;;  %v2372_v15 = vld [vmem:[#allocation10_spill] sm:$0xff] }
 0x1c2   :  { %v864_v22 = vpack.c.bf16 %v646_v23, %v645_v2  ;;  %v2373_v26 = vsub.f32 %v2371_v9, %v2372_v15  ;;  %v501_v51 = vmul.f32 1.442695, %v2382_v17  ;;  %v2384_v18 = vld [vmem:[#allocation18_spill] sm:$0xff]  ;;  %v657_v15 = vld [vmem:[#allocation3 + $0x40] sm:$0xff]  ;;  %v660_v17 = vld [vmem:[#allocation3 + $0x58] sm:$0xff] }
 0x1c3   :  { %v1434_v55 = vpop.eup %1433  ;;  %693 = vadd.xlane.f32.xlu1 %v639_v21  ;;  %v481_v13 = vmul.f32 1.442695, %v2360_v10  ;;  %v489_v27 = vmul.f32 1.442695, %v2364_v6 }
 0x1c4   :  { %1367 = vmatprep.mubr.bf16.mxu1 %v864_v22  ;;  %v640_v28 = vmul.f32 %v1434_v55, %v1809_v30  ;;  %v1436_v35 = vpop.eup %1435  ;;  %v473_v30 = vmul.f32 1.442695, %v2356_v16  ;;  %v495_v62 = vmul.f32 1.442695, %v2373_v26 }
 0x1c5   :  { %v647_v39 = vmul.f32 %v1436_v35, %v1826_v59  ;;  %v2357_v59 = vsub.f32 %v1907_v31, %v1922_v41  ;;  %v483_v31 = vmul.f32 1.442695, %v2361_v24 }
 0x1c6   :  { %695 = vadd.xlane.f32.xlu0 %v640_v28  ;;  %v861_v37 = vpack.c.bf16 %v640_v28, %v639_v21  ;;  %1439 = vpow2.f32 %v473_v30 }
 0x1c7   :  { %v1438_v44 = vpop.eup %1437  ;;  %697 = vadd.xlane.f32.xlu1 %v641_v29  ;;  %v477_v29 = vmul.f32 1.442695, %v2357_v59  ;;  %v650_v59 = vld [vmem:[#allocation3 + $0x8] sm:$0xff] }
 0x1c8   :  { %1360 = vmatmul.mubr.bf16.gmra.mrb[4].mxu0 %v861_v37  ;;  %v648_v48 = vmul.f32 %v1438_v44, %v1864_v5  ;;  %v2358_v5 = vsub.f32 %v1889_v14, %v1899_v25  ;;  %v2362_v14 = vsub.f32 %v1999_v34, %v2014_v33 }
 0x1c9   :  { %1441 = vpow2.f32 %v477_v29 }
 0x1ca   :  { %699 = vadd.xlane.f32.xlu0 %v2080_v0  ;;  %v865_v49 = vpack.c.bf16 %v648_v48, %v647_v39  ;;  %v475_v0 = vmul.f32 1.442695, %v2358_v5  ;;  %v485_v25 = vmul.f32 1.442695, %v2362_v14 }
 0x1cb   :  { %701 = vadd.xlane.f32.xlu1 %v643_v63  ;;  %v2377_v63 = vld [vmem:[#allocation13_spill] sm:$0xff] }
 0x1cc   :  { %1368 = vmatmul.mubr.bf16.gmra.mrb[4].mxu1 %v865_v49  ;;  %1443 = vpow2.f32 %v475_v0  ;;  %v651_v0 = vld [vmem:[#allocation3 + $0x10] sm:$0xff] }
 0x1cd   :  { %1445 = vpow2.f32 %v479_v36 }
 0x1ce   :  { %703 = vadd.xlane.f32.xlu0 %v644_v1  ;;  %1447 = vpow2.f32 %v481_v13  ;;  %v2378_v1 = vld [vmem:[#allocation14_spill] sm:$0xff]  ;;  %v652_v13 = vld [vmem:[#allocation3 + $0x18] sm:$0xff] }
 0x1cf   :  { %705 = vadd.xlane.f32.xlu1 %v645_v2  ;;  %1449 = vpow2.f32 %v483_v31  ;;  %v2379_v60 = vsub.f32 %v2377_v63, %v2378_v1  ;;  %v2385_v2 = vsub.f32 %v2383_v61, %v2384_v18  ;;  %v659_v1 = vld [vmem:[#allocation3 + $0x50] sm:$0xff]  ;;  %v661_v18 = vld [vmem:[#allocation3 + $0x60] sm:$0xff] }
 0x1d0   :  { %v1440_v41 = vpop.eup %1439  ;;  %1451 = vpow2.f32 %v485_v25  ;;  %v653_v25 = vld [vmem:[#allocation3 + $0x20] sm:$0xff] }
 0x1d1   :  { %1453 = vpow2.f32 %v487_v46  ;;  %v499_v45 = vmul.f32 1.442695, %v2379_v60 }
 0x1d2   :  { %707 = vadd.xlane.f32.xlu0 %v646_v23  ;;  %1455 = vpow2.f32 %v489_v27  ;;  %v503_v23 = vmul.f32 1.442695, %v2385_v2  ;;  %v654_v27 = vld [vmem:[#allocation3 + $0x28] sm:$0xff] }
 0x1d3   :  { %709 = vadd.xlane.f32.xlu1 %v647_v39  ;;  %v1442_v42 = vpop.eup %1441  ;;  %1457 = vpow2.f32 %v491_v43 }
 0x1d4   :  { %1459 = vpow2.f32 %v493_v19  ;;  %v667_v36 = vmul.f32 %v1442_v42, %v651_v0  ;;  %v656_v19 = vld [vmem:[#allocation3 + $0x38] sm:$0xff] }
 0x1d5   :  { %1461 = vpow2.f32 %v495_v62 }
 0x1d6   :  { %711 = vadd.xlane.f32.xlu0 %v648_v48  ;;  %v1444_v33 = vpop.eup %1443  ;;  %1463 = vpow2.f32 %v497_v4  ;;  %v649_v48 = vld [vmem:[#allocation3] sm:$0xff] }
 0x1d7   :  { %v1446_v34 = vpop.eup %1445  ;;  %1465 = vpow2.f32 %v499_v45  ;;  %v665_v49 = vmul.f32 %v1440_v41, %v649_v48  ;;  %v666_v29 = vmul.f32 %v1444_v33, %v650_v59  ;;  %v663_v59 = vld [vmem:[#allocation3 + $0x70] sm:$0xff] }
 0x1d8   :  { %v1448_v54 = vpop.eup %1447  ;;  %1467 = vpow2.f32 %v501_v51 }
 0x1d9   :  { %v1450_v20 = vpop.eup %1449  ;;  %1469 = vpow2.f32 %v503_v23  ;;  %v669_v6 = vmul.f32 %v1448_v54, %v653_v25 }
 0x1da   :  { %v2143_v40 = vpop.eup %1451 }
 0x1db   :  { %v2145_v7 = vpop.eup %1453 }
 0x1dc   :  { %v2155_v21 = vpop.eup %1455 }
 0x1dd   :  { %v2157_v22 = vpop.eup %1457  ;;  %v673_v52 = vmul.f32 %v2155_v21, %v657_v15 }
 0x1de   :  { %v2161_v55 = vpop.eup %1459  ;;  %v674_v38 = vmul.f32 %v2157_v22, %v658_v12 }
 0x1df   :  { %v2163_v28 = vpop.eup %1461 }
 0x1e0   :  { %v2167_v35 = vpop.eup %1463 }
 0x1e1   :  { %v2169_v37 = vpop.eup %1465 }
 0x1e2   :  { %v2173_v44 = vpop.eup %1467 }
 0x1e3   :  { %v2175_v39 = vpop.eup %1469 }
 0x1e4   :  { %764 = vperm.xlu1 %1398, %v1440_v41   ;;  %v668_v41 = vmul.f32 %v1446_v34, %v652_v13 }
 0x1e8   :  { %774 = vperm.xlu1 %1398, %v1442_v42   ;;  %v670_v42 = vmul.f32 %v1450_v20, %v654_v27 }
 0x1ec   :  { %779 = vperm.xlu1 %1398, %v1446_v34   ;;  %769 = vperm.xlu0 %1397, %v1444_v33   ;;  %v655_v34 = vld [vmem:[#allocation3 + $0x30] sm:$0xff] }
 0x1ed   :  { %v671_v58 = vmul.f32 %v2143_v40, %v655_v34 }
 0x1f0   :  { %789 = vperm.xlu1 %1398, %v1450_v20   ;;  %784 = vperm.xlu0 %1397, %v1448_v54   ;;  %v672_v54 = vmul.f32 %v2145_v7, %v656_v19 }
 0x1f4   :  { %799 = vperm.xlu1 %1398, %v2145_v7   ;;  %794 = vperm.xlu0 %1397, %v2143_v40   ;;  %v675_v7 = vmul.f32 %v2161_v55, %v659_v1 }
 0x1f8   :  { %809 = vperm.xlu1 %1398, %v2157_v22   ;;  %804 = vperm.xlu0 %1397, %v2155_v21   ;;  %v676_v21 = vmul.f32 %v2163_v28, %v660_v17  ;;  %v677_v22 = vmul.f32 %v2167_v35, %v661_v18 }
 0x1fc   :  { %819 = vperm.xlu1 %1398, %v2163_v28   ;;  %814 = vperm.xlu0 %1397, %v2161_v55  }
 0x200   :  { %829 = vperm.xlu1 %1398, %v2169_v37   ;;  %824 = vperm.xlu0 %1397, %v2167_v35   ;;  %v679_v35 = vmul.f32 %v2173_v44, %v663_v59 }
 0x204   :  { %839 = vperm.xlu1 %1398, %v2175_v39   ;;  %834 = vperm.xlu0 %1397, %v2173_v44  }
 0x237   :  { %v682_v16 = vpop.xlane.xlu0 %681 }
 0x238   :  { %v713_v30 = vadd.f32 %v682_v16, %v665_v49  ;;  %v662_v16 = vld [vmem:[#allocation3 + $0x68] sm:$0xff] }
 0x23a   :  { %730 = vst.msk [vmem:[#allocation3] sm:$0xff] %vm25_vm0, %v713_v30 }
 0x23b   :  { %v684_v5 = vpop.xlane.xlu1 %683 }
 0x23c   :  { %v714_v8 = vadd.f32 %v684_v5, %v666_v29 }
 0x23e   :  { %731 = vst.msk [vmem:[#allocation3 + $0x8] sm:$0xff] %vm25_vm0, %v714_v8  ;;  %v678_v8 = vmul.f32 %v2169_v37, %v662_v16 }
 0x240   :  { %v686_v10 = vpop.xlane.xlu0 %685 }
 0x241   :  { %v715_v24 = vadd.f32 %v686_v10, %v667_v36  ;;  %v1094_v31 = vld [vmem:[#allocation3] sm:$0xff]  ;;  %v664_v10 = vld [vmem:[#allocation3 + $0x78] sm:$0xff] }
 0x242   :  { %1471 = vrcp.f32 %v1094_v31  ;;  %v680_v25 = vmul.f32 %v2175_v39, %v664_v10 }
 0x243   :  { %732 = vst.msk [vmem:[#allocation3 + $0x10] sm:$0xff] %vm25_vm0, %v715_v24 }
 0x244   :  { %v688_v14 = vpop.xlane.xlu0 %687 }
 0x245   :  { %v716_v53 = vadd.f32 %v688_v14, %v668_v41  ;;  %v1095_v46 = vld [vmem:[#allocation3 + $0x8] sm:$0xff] }
 0x246   :  { %1473 = vrcp.f32 %v1095_v46 }
 0x247   :  { %733 = vst.msk [vmem:[#allocation3 + $0x18] sm:$0xff] %vm25_vm0, %v716_v53 }
 0x248   :  { %v690_v56 = vpop.xlane.xlu1 %689 }
 0x249   :  { %v717_v57 = vadd.f32 %v690_v56, %v669_v6 }
 0x24a   :  { %v1096_v47 = vld [vmem:[#allocation3 + $0x10] sm:$0xff] }
 0x24b   :  { %734 = vst.msk [vmem:[#allocation3 + $0x20] sm:$0xff] %vm25_vm0, %v717_v57  ;;  %v692_v43 = vpop.xlane.xlu0 %691  ;;  %1475 = vrcp.f32 %v1096_v47 }
 0x24c   :  { %v1472_v33 = vpop.eup %1471  ;;  %v718_v50 = vadd.f32 %v692_v43, %v670_v42 }
 0x24d   :  { %1128 = vperm.xlu0 %1397, %v1472_v33  }
 0x24e   :  { %735 = vst.msk [vmem:[#allocation3 + $0x28] sm:$0xff] %vm25_vm0, %v718_v50  ;;  %v1097_v32 = vld [vmem:[#allocation3 + $0x18] sm:$0xff] }
 0x24f   :  { %1477 = vrcp.f32 %v1097_v32 }
 0x250   :  { %v694_v9 = vpop.xlane.xlu1 %693  ;;  %v1474_v26 = vpop.eup %1473 }
 0x251   :  { %v719_v62 = vadd.f32 %v694_v9, %v671_v58  ;;  %1133 = vperm.xlu1 %1398, %v1474_v26  }
 0x252   :  { %v1098_v20 = vld [vmem:[#allocation3 + $0x20] sm:$0xff] }
 0x253   :  { %736 = vst.msk [vmem:[#allocation3 + $0x30] sm:$0xff] %vm25_vm0, %v719_v62  ;;  %v696_v3 = vpop.xlane.xlu0 %695  ;;  %1479 = vrcp.f32 %v1098_v20 }
 0x254   :  { %v698_v4 = vpop.xlane.xlu1 %697  ;;  %v720_v63 = vadd.f32 %v696_v3, %v672_v54 }
 0x255   :  { %v1476_v60 = vpop.eup %1475  ;;  %v721_v45 = vadd.f32 %v698_v4, %v673_v52  ;;  %v1099_v40 = vld [vmem:[#allocation3 + $0x28] sm:$0xff] }
 0x256   :  { %737 = vst.msk [vmem:[#allocation3 + $0x38] sm:$0xff] %vm25_vm0, %v720_v63  ;;  %1138 = vperm.xlu0 %1397, %v1476_v60   ;;  %1481 = vrcp.f32 %v1099_v40 }
 0x257   :  { %738 = vst.msk [vmem:[#allocation3 + $0x40] sm:$0xff] %vm25_vm0, %v721_v45  ;;  %v700_v11 = vpop.xlane.xlu0 %699 }
 0x258   :  { %v702_v51 = vpop.xlane.xlu1 %701  ;;  %v722_v61 = vadd.f32 %v700_v11, %v674_v38 }
 0x259   :  { %v1478_v2 = vpop.eup %1477  ;;  %v723_v23 = vadd.f32 %v702_v51, %v675_v7 }
 0x25a   :  { %739 = vst.msk [vmem:[#allocation3 + $0x48] sm:$0xff] %vm25_vm0, %v722_v61  ;;  %1143 = vperm.xlu1 %1398, %v1478_v2   ;;  %v1100_v48 = vld [vmem:[#allocation3 + $0x30] sm:$0xff] }
 0x25b   :  { %740 = vst.msk [vmem:[#allocation3 + $0x50] sm:$0xff] %vm25_vm0, %v723_v23  ;;  %v704_v49 = vpop.xlane.xlu0 %703  ;;  %1483 = vrcp.f32 %v1100_v48 }
 0x25c   :  { %v706_v55 = vpop.xlane.xlu1 %705  ;;  %v724_v30 = vadd.f32 %v704_v49, %v676_v21 }
 0x25d   :  { %v1480_v29 = vpop.eup %1479  ;;  %v725_v5 = vadd.f32 %v706_v55, %v677_v22  ;;  %v1101_v0 = vld [vmem:[#allocation3 + $0x38] sm:$0xff] }
 0x25e   :  { %741 = vst.msk [vmem:[#allocation3 + $0x58] sm:$0xff] %vm25_vm0, %v724_v30  ;;  %1148 = vperm.xlu0 %1397, %v1480_v29   ;;  %v1102_v28 = vld [vmem:[#allocation3 + $0x40] sm:$0xff]  ;;  %1485 = vrcp.f32 %v1101_v0 }
 0x25f   :  { %742 = vst.msk [vmem:[#allocation3 + $0x60] sm:$0xff] %vm25_vm0, %v725_v5  ;;  %v708_v36 = vpop.xlane.xlu0 %707  ;;  %1487 = vrcp.f32 %v1102_v28  ;;  %v2238_v5 = vld [vmem:[%s2326_s4] ss:$0 sm:$0xff] }
 0x260   :  { %v1482_v13 = vpop.eup %1481  ;;  %v710_v24 = vpop.xlane.xlu1 %709  ;;  %v726_v31 = vadd.f32 %v708_v36, %v678_v8 }
 0x261   :  { %v727_v41 = vadd.f32 %v710_v24, %v679_v35  ;;  %1153 = vperm.xlu1 %1398, %v1482_v13   ;;  %v1103_v14 = vld [vmem:[#allocation3 + $0x48] sm:$0xff] }
 0x262   :  { %743 = vst.msk [vmem:[#allocation3 + $0x68] sm:$0xff] %vm25_vm0, %v726_v31  ;;  %v1104_v37 = vld [vmem:[#allocation3 + $0x50] sm:$0xff]  ;;  %1489 = vrcp.f32 %v1103_v14 }
 0x263   :  { %744 = vst.msk [vmem:[#allocation3 + $0x70] sm:$0xff] %vm25_vm0, %v727_v41  ;;  %v712_v53 = vpop.xlane.xlu0 %711  ;;  %1491 = vrcp.f32 %v1104_v37 }
 0x264   :  { %v728_v44 = vadd.f32 %v712_v53, %v680_v25  ;;  %v765_v63 = vpop.permute.xlu1 %764 }
 0x265   :  { %v1484_v46 = vpop.eup %1483  ;;  %v1105_v6 = vld [vmem:[#allocation3 + $0x58] sm:$0xff]  ;;  %v842_v59 = vmul.f32 0.0, %v765_v63 }
 0x266   :  { %745 = vst.msk [vmem:[#allocation3 + $0x78] sm:$0xff] %vm25_vm0, %v728_v44  ;;  %1158 = vperm.xlu0 %1397, %v1484_v46   ;;  %v1106_v27 = vld [vmem:[#allocation3 + $0x60] sm:$0xff]  ;;  %1493 = vrcp.f32 %v1105_v6 }
 0x267   :  { %1495 = vrcp.f32 %v1106_v27 }
 0x268   :  { %v1486_v56 = vpop.eup %1485  ;;  %v775_v11 = vpop.permute.xlu1 %774 }
 0x269   :  { %v1488_v57 = vpop.eup %1487  ;;  %1163 = vperm.xlu1 %1398, %v1486_v56   ;;  %v1107_v42 = vld [vmem:[#allocation3 + $0x68] sm:$0xff]  ;;  %v844_v24 = vmul.f32 0.0, %v775_v11 }
 0x26a   :  { %1168 = vperm.xlu0 %1397, %v1488_v57   ;;  %v1108_v39 = vld [vmem:[#allocation3 + $0x70] sm:$0xff]  ;;  %1497 = vrcp.f32 %v1107_v42 }
 0x26b   :  { %1499 = vrcp.f32 %v1108_v39  ;;  %v770_v17 = vpop.permute.xlu0 %769 }
 0x26c   :  { %v1490_v47 = vpop.eup %1489  ;;  %v780_v51 = vpop.permute.xlu1 %779  ;;  %v843_v35 = vmul.f32 0.0, %v770_v17 }
 0x26d   :  { %v1492_v43 = vpop.eup %1491  ;;  %1173 = vperm.xlu1 %1398, %v1490_v47   ;;  %v1109_v33 = vld [vmem:[#allocation3 + $0x78] sm:$0xff]  ;;  %v845_v37 = vmul.f32 0.0, %v780_v51 }
 0x26e   :  { %1178 = vperm.xlu0 %1397, %v1492_v43   ;;  %1501 = vrcp.f32 %v1109_v33 }
 0x26f   :  { %v785_v61 = vpop.permute.xlu0 %784 }
 0x270   :  { %v1494_v50 = vpop.eup %1493  ;;  %v790_v18 = vpop.permute.xlu1 %789  ;;  %v846_v27 = vmul.f32 0.0, %v785_v61 }
 0x271   :  { %v1496_v34 = vpop.eup %1495  ;;  %1183 = vperm.xlu1 %1398, %v1494_v50   ;;  %v847_v47 = vmul.f32 0.0, %v790_v18 }
 0x272   :  { %1188 = vperm.xlu0 %1397, %v1496_v34  }
 0x273   :  { %v795_v2 = vpop.permute.xlu0 %794 }
 0x274   :  { %v1498_v32 = vpop.eup %1497  ;;  %v800_v23 = vpop.permute.xlu1 %799 }
 0x275   :  { %v1500_v58 = vpop.eup %1499  ;;  %1193 = vperm.xlu1 %1398, %v1498_v32  }
 0x276   :  { %1198 = vperm.xlu0 %1397, %v1500_v58  }
 0x277   :  { %v805_v21 = vpop.permute.xlu0 %804 }
 0x278   :  { %v1502_v19 = vpop.eup %1501  ;;  %v810_v48 = vpop.permute.xlu1 %809 }
 0x279   :  { %1203 = vperm.xlu1 %1398, %v1502_v19  }
 0x27b   :  { %v2225_v22 = vpop.permute.xlu0 %814 }
 0x27c   :  { %v2227_v49 = vpop.permute.xlu1 %819 }
 0x27f   :  { %v2229_v16 = vpop.permute.xlu0 %824 }
 0x280   :  { %v2231_v55 = vpop.permute.xlu1 %829 }
 0x283   :  { %v2233_v30 = vpop.permute.xlu0 %834 }
 0x284   :  { %v2240_v8 = vpop.permute.xlu1 %839 }
 0x28b   :  { %v1357_v9 = vpop.f32.mrb[0].mxu0 }
 0x28c   :  { %v964_v15 = vpop.f32.mrb[1].mxu0  ;;  %v1029_v41 = vadd.f32 %v1357_v9, %v844_v24  ;;  %v848_v9 = vmul.f32 0.0, %v795_v2 }
 0x28d   :  { %v1358_v26 = vpop.f32.mrb[2].mxu0  ;;  %v1027_v29 = vadd.f32 %v964_v15, %v842_v59  ;;  %v851_v59 = vmul.f32 0.0, %v810_v48 }
 0x28e   :  { %v967_v62 = vpop.f32.mrb[3].mxu0  ;;  %v1030_v44 = vadd.f32 %v1358_v26, %v845_v37 }
 0x28f   :  { %v2205_v54 = vpop.f32.mrb[0].mxu1  ;;  %v1028_v10 = vadd.f32 %v967_v62, %v843_v35 }
 0x290   :  { %v2207_v20 = vpop.f32.mrb[1].mxu1 }
 0x291   :  { %v2209_v52 = vpop.f32.mrb[2].mxu1 }
 0x292   :  { %v2211_v3 = vpop.f32.mrb[3].mxu1 }
 0x29b   :  { %v2213_v12 = vpop.f32.mrb[4].mxu0 }
 0x29c   :  { %v980_v4 = vpop.f32.mrb[5].mxu0  ;;  %v1033_v62 = vadd.f32 %v2213_v12, %v848_v9 }
 0x29d   :  { %v2215_v1 = vpop.f32.mrb[6].mxu0  ;;  %v1031_v42 = vadd.f32 %v980_v4, %v846_v27  ;;  %v849_v4 = vmul.f32 0.0, %v800_v23 }
 0x29e   :  { %v983_v60 = vpop.f32.mrb[7].mxu0 }
 0x29f   :  { %v2217_v45 = vpop.f32.mrb[4].mxu1  ;;  %v1032_v50 = vadd.f32 %v983_v60, %v847_v47  ;;  %v850_v60 = vmul.f32 0.0, %v805_v21  ;;  %v1034_v17 = vadd.f32 %v2215_v1, %v849_v4 }
 0x2a0   :  { %v2219_v40 = vpop.f32.mrb[5].mxu1 }
 0x2a1   :  { %v2221_v38 = vpop.f32.mrb[6].mxu1  ;;  %v1035_v61 = vadd.f32 %v2207_v20, %v850_v60 }
 0x2a2   :  { %v2223_v7 = vpop.f32.mrb[7].mxu1 }
 0x2cc   :  { %v1129_v0 = vpop.permute.xlu0 %1128 }
 0x2cd   :  { %v1206_v28 = vmul.f32 %v1129_v0, %v1027_v29  ;;  %v852_v29 = vmul.f32 0.0, %v2225_v22  ;;  %v1036_v0 = vadd.f32 %v2211_v3, %v851_v59 }
 0x2cf   :  { %v1229_v36 = vadd.f32 %v2238_v5, %v1206_v28  ;;  %v1037_v20 = vadd.f32 %v2205_v54, %v852_v29 }
 0x2d0   :  { %v1134_v13 = vpop.permute.xlu1 %1133 }
 0x2d1   :  { %1503 = vtanh.f32 %v1229_v36  ;;  %v1207_v31 = vmul.f32 %v1134_v13, %v1028_v10  ;;  %v853_v36 = vmul.f32 0.0, %v2227_v49  ;;  %v854_v13 = vmul.f32 0.0, %v2229_v16 }
 0x2d3   :  { %v1230_v14 = vadd.f32 %v2238_v5, %v1207_v31  ;;  %v1038_v31 = vadd.f32 %v2209_v52, %v853_v36 }
 0x2d5   :  { %v1139_v25 = vpop.permute.xlu0 %1138  ;;  %1505 = vtanh.f32 %v1230_v14 }
 0x2d6   :  { %v1208_v53 = vmul.f32 %v1139_v25, %v1029_v41  ;;  %v1039_v41 = vadd.f32 %v2219_v40, %v854_v13  ;;  %v855_v25 = vmul.f32 0.0, %v2231_v55 }
 0x2d8   :  { %v1231_v46 = vadd.f32 %v2238_v5, %v1208_v53  ;;  %v856_v53 = vmul.f32 0.0, %v2233_v30 }
 0x2d9   :  { %v1144_v6 = vpop.permute.xlu1 %1143 }
 0x2da   :  { %1507 = vtanh.f32 %v1231_v46  ;;  %v1209_v56 = vmul.f32 %v1144_v6, %v1030_v44  ;;  %v1040_v44 = vadd.f32 %v2223_v7, %v855_v25  ;;  %v1041_v6 = vadd.f32 %v2217_v45, %v856_v53 }
 0x2db   :  { %v1504_v57 = vpop.eup %1503 }
 0x2dc   :  { %1261 = vst [vmem:[%s2327_s5] sm:$0xff] %v1504_v57  ;;  %v1232_v39 = vadd.f32 %v2238_v5, %v1209_v56  ;;  %v857_v57 = vmul.f32 0.0, %v2240_v8 }
 0x2dd   :  { %v1149_v43 = vpop.permute.xlu0 %1148 }
 0x2de   :  { %1509 = vtanh.f32 %v1232_v39  ;;  %v1210_v33 = vmul.f32 %v1149_v43, %v1031_v42  ;;  %v1042_v39 = vadd.f32 %v2221_v38, %v857_v57 }
 0x2df   :  { %v1506_v34 = vpop.eup %1505 }
 0x2e0   :  { %v1233_v32 = vadd.f32 %v2238_v5, %v1210_v33  ;;  %v1154_v58 = vpop.permute.xlu1 %1153  ;;  %1262 = vst [vmem:[%s2327_s5 + $0x8] sm:$0xff] %v1506_v34 }
 0x2e1   :  { %v1211_v19 = vmul.f32 %v1154_v58, %v1032_v50 }
 0x2e2   :  { %1511 = vtanh.f32 %v1233_v32 }
 0x2e3   :  { %v1234_v15 = vadd.f32 %v2238_v5, %v1211_v19 }
 0x2e4   :  { %v1508_v26 = vpop.eup %1507 }
 0x2e5   :  { %1263 = vst [vmem:[%s2327_s5 + $0x10] sm:$0xff] %v1508_v26  ;;  %1513 = vtanh.f32 %v1234_v15  ;;  %v1159_v63 = vpop.permute.xlu0 %1158 }
 0x2e6   :  { %v1212_v11 = vmul.f32 %v1159_v63, %v1033_v62 }
 0x2e8   :  { %v1510_v51 = vpop.eup %1509  ;;  %v1235_v18 = vadd.f32 %v2238_v5, %v1212_v11  ;;  %v1164_v2 = vpop.permute.xlu1 %1163 }
 0x2e9   :  { %1264 = vst [vmem:[%s2327_s5 + $0x18] sm:$0xff] %v1510_v51  ;;  %v1213_v12 = vmul.f32 %v1164_v2, %v1034_v17  ;;  %v1169_v23 = vpop.permute.xlu0 %1168 }
 0x2ea   :  { %1515 = vtanh.f32 %v1235_v18  ;;  %v1214_v21 = vmul.f32 %v1169_v23, %v1035_v61 }
 0x2eb   :  { %v1236_v1 = vadd.f32 %v2238_v5, %v1213_v12 }
 0x2ec   :  { %v1512_v28 = vpop.eup %1511  ;;  %v1237_v35 = vadd.f32 %v2238_v5, %v1214_v21  ;;  %v1174_v48 = vpop.permute.xlu1 %1173 }
 0x2ed   :  { %1265 = vst [vmem:[%s2327_s5 + $0x20] sm:$0xff] %v1512_v28  ;;  %1517 = vtanh.f32 %v1236_v1  ;;  %v1215_v22 = vmul.f32 %v1174_v48, %v1036_v0  ;;  %v1179_v10 = vpop.permute.xlu0 %1178 }
 0x2ee   :  { %1519 = vtanh.f32 %v1237_v35  ;;  %v1216_v3 = vmul.f32 %v1179_v10, %v1037_v20 }
 0x2ef   :  { %v1514_v24 = vpop.eup %1513  ;;  %v1238_v54 = vadd.f32 %v2238_v5, %v1215_v22 }
 0x2f0   :  { %1266 = vst [vmem:[%s2327_s5 + $0x28] sm:$0xff] %v1514_v24  ;;  %v1239_v49 = vadd.f32 %v2238_v5, %v1216_v3  ;;  %v1184_v14 = vpop.permute.xlu1 %1183 }
 0x2f1   :  { %1521 = vtanh.f32 %v1238_v54  ;;  %v1217_v16 = vmul.f32 %v1184_v14, %v1038_v31  ;;  %v1189_v37 = vpop.permute.xlu0 %1188 }
 0x2f2   :  { %1523 = vtanh.f32 %v1239_v49  ;;  %v1218_v52 = vmul.f32 %v1189_v37, %v1039_v41 }
 0x2f3   :  { %v1240_v40 = vadd.f32 %v2238_v5, %v1217_v16 }
 0x2f4   :  { %v1516_v46 = vpop.eup %1515  ;;  %v1241_v27 = vadd.f32 %v2238_v5, %v1218_v52  ;;  %v1194_v56 = vpop.permute.xlu1 %1193 }
 0x2f5   :  { %1267 = vst [vmem:[%s2327_s5 + $0x30] sm:$0xff] %v1516_v46  ;;  %1525 = vtanh.f32 %v1240_v40  ;;  %v1219_v55 = vmul.f32 %v1194_v56, %v1040_v44  ;;  %v1199_v30 = vpop.permute.xlu0 %1198 }
 0x2f6   :  { %1527 = vtanh.f32 %v1241_v27  ;;  %v1220_v42 = vmul.f32 %v1199_v30, %v1041_v6 }
 0x2f7   :  { %v1518_v7 = vpop.eup %1517  ;;  %v1242_v47 = vadd.f32 %v2238_v5, %v1219_v55 }
 0x2f8   :  { %v1520_v45 = vpop.eup %1519  ;;  %1268 = vst [vmem:[%s2327_s5 + $0x38] sm:$0xff] %v1518_v7  ;;  %v1243_v8 = vadd.f32 %v2238_v5, %v1220_v42  ;;  %v1204_v43 = vpop.permute.xlu1 %1203 }
 0x2f9   :  { %1269 = vst [vmem:[%s2327_s5 + $0x40] sm:$0xff] %v1520_v45  ;;  %1529 = vtanh.f32 %v1242_v47  ;;  %v1221_v33 = vmul.f32 %v1204_v43, %v1042_v39 }
 0x2fa   :  { %1531 = vtanh.f32 %v1243_v8 }
 0x2fb   :  { %v1522_v50 = vpop.eup %1521  ;;  %v1244_v38 = vadd.f32 %v2238_v5, %v1221_v33 }
 0x2fc   :  { %v1524_v34 = vpop.eup %1523  ;;  %1270 = vst [vmem:[%s2327_s5 + $0x48] sm:$0xff] %v1522_v50 }
 0x2fd   :  { %1271 = vst [vmem:[%s2327_s5 + $0x50] sm:$0xff] %v1524_v34  ;;  %1533 = vtanh.f32 %v1244_v38 }
 0x2ff   :  { %v1526_v32 = vpop.eup %1525 }
 0x300   :  { %v1528_v58 = vpop.eup %1527  ;;  %1272 = vst [vmem:[%s2327_s5 + $0x58] sm:$0xff] %v1526_v32 }
 0x301   :  { %1273 = vst [vmem:[%s2327_s5 + $0x60] sm:$0xff] %v1528_v58 }
 0x303   :  { %v1530_v5 = vpop.eup %1529 }
 0x304   :  { %v1532_v19 = vpop.eup %1531  ;;  %1274 = vst [vmem:[%s2327_s5 + $0x68] sm:$0xff] %v1530_v5 }
 0x305   :  { %1275 = vst [vmem:[%s2327_s5 + $0x70] sm:$0xff] %v1532_v19 }
 0x307   :  { %v1534_v9 = vpop.eup %1533 }
 0x308   :  { %1276 = vst [vmem:[%s2327_s5 + $0x78] sm:$0xff] %v1534_v9 }

</bundles_post_ra>
